<compile_context>
chip_gen: v7x
topology: tpu7x:2x2x1
jax: 0.10.0
libtpu: 0.0.40
codegen_flags: <defaults>
</compile_context>

<pallas_src>
import functools

import jax
import jax.numpy as jnp
from jax.experimental import pallas as pl
from jax.experimental.pallas import tpu as pltpu


def vae_kernel(x_ref, eps_ref,
               w1_ref, b1_ref, wml_ref, bml_ref,
               w3_ref, b3_ref, w4_ref, b4_ref,
               dec_ref, mu_ref, lv_ref):
    d_lat = mu_ref.shape[-1]

    # ---- encoder ----
    x = x_ref[...].astype(jnp.bfloat16)
    h = jnp.dot(x, w1_ref[...], preferred_element_type=jnp.float32) + b1_ref[...]
    h = jnp.maximum(h, 0.0)                                   # ReLU (f32)

    # fused mu|log_var head: one N = 2*D_lat matmul, slice columns afterwards
    ml = jnp.dot(h.astype(jnp.bfloat16), wml_ref[...],
                 preferred_element_type=jnp.float32) + bml_ref[...]
    mu = ml[:, :d_lat]
    lv = ml[:, d_lat:]

    # ---- reparameterization (f32): sample = mu + eps * exp(0.5 * log_var) ----
    std = jnp.exp(0.5 * lv)
    z = mu + eps_ref[...] * std

    # ---- decoder ----
    h2 = jnp.dot(z.astype(jnp.bfloat16), w3_ref[...],
                 preferred_element_type=jnp.float32) + b3_ref[...]
    h2 = jnp.maximum(h2, 0.0)                                 # ReLU (f32)
    logits = jnp.dot(h2.astype(jnp.bfloat16), w4_ref[...],
                     preferred_element_type=jnp.float32) + b4_ref[...]
    # sigmoid(x) = 0.5*(tanh(x/2)+1): single EUP transcendental per element (f32)
    dec = 0.5 * (jnp.tanh(0.5 * logits) + 1.0)
    dec_ref[...] = dec.astype(dec_ref.dtype)

    mu_ref[...] = mu
    lv_ref[...] = lv


def _round_up(v, m):
    return ((v + m - 1) // m) * m


def _multi_tensorcore():
    # v7x has 2 TensorCores per chip; v5e/v6e have 1. Trace-time Python check.
    try:
        return "v7" in jax.devices()[0].device_kind.lower()
    except Exception:
        return False


@functools.partial(jax.jit, static_argnames=("dec_dtype",))
def vae_forward(x_nchw, eps, params, dec_dtype=jnp.float32):
    """x_nchw: (B, C, H, W). Returns (decoded_nchw, mu, log_var)."""
    B, C, H, W = x_nchw.shape
    D_in = C * H * W
    D_hid = params["w1"].shape[1]
    D_lat = params["wml"].shape[1] // 2

    # Keep the caller's dtype: a bf16 producer halves x HBM traffic; f32 matches torch.
    x_flat = x_nchw.reshape(B, D_in)

    # Batch tiling: 16-row alignment (bf16 sublane packing after the in-kernel cast),
    # tile capped at 256 rows.
    B_pad = _round_up(B, 16)
    block_b = min(256, B_pad)
    # On v7x, make sure the "parallel" batch axis has >= 2 grid steps to use both TCs.
    if _multi_tensorcore() and B_pad >= 32:
        block_b = min(block_b, _round_up(B_pad // 2, 16))
    B_pad = _round_up(B_pad, block_b)
    grid = (B_pad // block_b,)

    if B_pad != B:
        x_flat = jnp.pad(x_flat, ((0, B_pad - B), (0, 0)))
        eps_p = jnp.pad(eps, ((0, B_pad - B), (0, 0)))
    else:
        eps_p = eps

    # Per-batch-tile activation specs (double-buffered by default); weights/biases
    # pinned to block (0,0) and single-buffered (constant index map -> no revisit DMA).
    act = lambda n: pl.BlockSpec((block_b, n), lambda i: (i, 0))
    resident = lambda shape: pl.BlockSpec(shape, lambda i: (0, 0),
                                          pipeline_mode=pl.Buffered(1))

    in_specs = [
        act(D_in),                       # x
        act(D_lat),                      # eps
        resident((D_in, D_hid)),         # w1
        resident((1, D_hid)),            # b1
        resident((D_hid, 2 * D_lat)),    # wml (fused mu|log_var)
        resident((1, 2 * D_lat)),        # bml
        resident((D_lat, D_hid)),        # w3
        resident((1, D_hid)),            # b3
        resident((D_hid, D_in)),         # w4
        resident((1, D_in)),             # b4
    ]
    out_specs = (act(D_in), act(D_lat), act(D_lat))

    # Roofline hint for XLA scheduling around the custom call.
    flops = 2 * B_pad * (D_in * D_hid + D_hid * 2 * D_lat
                         + D_lat * D_hid + D_hid * D_in)
    weight_bytes = 2 * (D_in * D_hid + D_hid * 2 * D_lat
                        + D_lat * D_hid + D_hid * D_in)            # bf16 weights
    bias_bytes = 4 * (D_hid + 2 * D_lat + D_hid + D_in)
    x_bytes = jnp.dtype(x_flat.dtype).itemsize * B_pad * D_in
    dec_bytes = jnp.dtype(dec_dtype).itemsize * B_pad * D_in
    other_act_bytes = 4 * B_pad * (D_lat + 2 * D_lat)              # eps + mu + lv
    cost = pl.CostEstimate(
        flops=int(flops),
        transcendentals=int(B_pad * (D_lat + D_in)),               # exp(std) + tanh(sigmoid)
        bytes_accessed=int(weight_bytes + bias_bytes + x_bytes + dec_bytes
                           + other_act_bytes),
    )

    dec_flat, mu, log_var = pl.pallas_call(
        vae_kernel,
        grid=grid,
        in_specs=in_specs,
        out_specs=out_specs,
        out_shape=(
            jax.ShapeDtypeStruct((B_pad, D_in), dec_dtype),
            jax.ShapeDtypeStruct((B_pad, D_lat), jnp.float32),
            jax.ShapeDtypeStruct((B_pad, D_lat), jnp.float32),
        ),
        compiler_params=pltpu.CompilerParams(
            dimension_semantics=("parallel",),     # shard batch tiles on v7x's 2 TCs
            vmem_limit_bytes=32 * 1024 * 1024,
        ),
        cost_estimate=cost,
    )(x_flat, eps_p, params["w1"], params["b1"], params["wml"], params["bml"],
      params["w3"], params["b3"], params["w4"], params["b4"])

    dec_flat = dec_flat[:B]
    mu = mu[:B]
    log_var = log_var[:B]
    return dec_flat.reshape(B, C, H, W), mu, log_var


def init_params(key, d_in, d_hidden, d_lat):
    ks = jax.random.split(key, 6)
    scale = 0.02
    # Weights stored in bf16 (halves weight HBM traffic); biases stay f32.
    wmu = scale * jax.random.normal(ks[1], (d_hidden, d_lat), jnp.float32)
    wlv = scale * jax.random.normal(ks[2], (d_hidden, d_lat), jnp.float32)
    return {
        "w1":  (scale * jax.random.normal(ks[0], (d_in, d_hidden), jnp.float32)).astype(jnp.bfloat16),
        "b1":  jnp.zeros((1, d_hidden), jnp.float32),
        # mu|log_var heads pre-fused once here (not per forward call).
        "wml": jnp.concatenate([wmu, wlv], axis=1).astype(jnp.bfloat16),
        "bml": jnp.zeros((1, 2 * d_lat), jnp.float32),
        "w3":  (scale * jax.random.normal(ks[3], (d_lat, d_hidden), jnp.float32)).astype(jnp.bfloat16),
        "b3":  jnp.zeros((1, d_hidden), jnp.float32),
        "w4":  (scale * jax.random.normal(ks[4], (d_hidden, d_in), jnp.float32)).astype(jnp.bfloat16),
        "b4":  jnp.zeros((1, d_in), jnp.float32),
    }


if __name__ == "__main__":
    # Small shapes consistent with a VAE forward: batch=2, channels=4, 16x16 images.
    B, C, H, W = 2, 4, 16, 16
    D_in = C * H * W          # 1024
    D_hidden = 256
    D_lat = 128

    key = jax.random.PRNGKey(0)
    k_x, k_eps, k_p = jax.random.split(key, 3)

    x = jax.random.uniform(k_x, (B, C, H, W), jnp.float32)        # image-like input
    eps = jax.random.normal(k_eps, (B, D_lat), jnp.float32)       # torch.randn_like(std)
    params = init_params(k_p, D_in, D_hidden, D_lat)

    decoded, mu, log_var = jax.block_until_ready(vae_forward(x, eps, params))

    # Pure-JAX reference emulating the same bf16-operand / f32-accumulate matmuls.
    def ref(x, eps, p):
        def mm(a, w):
            return jnp.dot(a.astype(jnp.bfloat16), w, preferred_element_type=jnp.float32)
        xf = x.reshape(B, D_in)
        h = jnp.maximum(mm(xf, p["w1"]) + p["b1"], 0.0)
        ml = mm(h, p["wml"]) + p["bml"]
        mu_r, lv_r = ml[:, :D_lat], ml[:, D_lat:]
        z = mu_r + eps * jnp.exp(0.5 * lv_r)
        h2 = jnp.maximum(mm(z, p["w3"]) + p["b3"], 0.0)
        dec = jax.nn.sigmoid(mm(h2, p["w4"]) + p["b4"])
        return dec.reshape(B, C, H, W), mu_r, lv_r

    dec_r, mu_r, lv_r = ref(x, eps, params)
    assert decoded.shape == (B, C, H, W) and mu.shape == (B, D_lat) and log_var.shape == (B, D_lat)
    assert jnp.allclose(decoded, dec_r, atol=2e-3, rtol=2e-3)
    assert jnp.allclose(mu, mu_r, atol=2e-3, rtol=2e-3)
    assert jnp.allclose(log_var, lv_r, atol=2e-3, rtol=2e-3)

    print("KERNEL_OK")
</pallas_src>

<mosaic_0001>
module attributes {stable_mosaic.version = 11 : i64} {
  func.func @vae_kernel(%arg0: i32, %arg1: memref<16x1024xf32, #tpu.memory_space<vmem>>, %arg2: memref<16x128xf32, #tpu.memory_space<vmem>>, %arg3: memref<1024x256xbf16, #tpu.memory_space<vmem>>, %arg4: memref<1x256xf32, #tpu.memory_space<vmem>>, %arg5: memref<256x256xbf16, #tpu.memory_space<vmem>>, %arg6: memref<1x256xf32, #tpu.memory_space<vmem>>, %arg7: memref<128x256xbf16, #tpu.memory_space<vmem>>, %arg8: memref<1x256xf32, #tpu.memory_space<vmem>>, %arg9: memref<256x1024xbf16, #tpu.memory_space<vmem>>, %arg10: memref<1x1024xf32, #tpu.memory_space<vmem>>, %arg11: memref<16x1024xf32, #tpu.memory_space<vmem>>, %arg12: memref<16x128xf32, #tpu.memory_space<vmem>>, %arg13: memref<16x128xf32, #tpu.memory_space<vmem>>) attributes {dimension_semantics = [#tpu.dimension_semantics<parallel>], iteration_bounds = array<i64: 1>, scalar_prefetch = 0 : i64, scratch_operands = 0 : i64, tpu.core_type = #tpu.core_type<tc>, window_params = [{transform_indices = @transform_0, window_bounds = array<i64: 16, 1024>}, {transform_indices = @transform_1, window_bounds = array<i64: 16, 128>}, {pipeline_mode = #tpu.pipeline_mode<synchronous>, transform_indices = @transform_2, window_bounds = array<i64: 1024, 256>}, {pipeline_mode = #tpu.pipeline_mode<synchronous>, transform_indices = @transform_3, window_bounds = array<i64: 1, 256>}, {pipeline_mode = #tpu.pipeline_mode<synchronous>, transform_indices = @transform_4, window_bounds = array<i64: 256, 256>}, {pipeline_mode = #tpu.pipeline_mode<synchronous>, transform_indices = @transform_5, window_bounds = array<i64: 1, 256>}, {pipeline_mode = #tpu.pipeline_mode<synchronous>, transform_indices = @transform_6, window_bounds = array<i64: 128, 256>}, {pipeline_mode = #tpu.pipeline_mode<synchronous>, transform_indices = @transform_7, window_bounds = array<i64: 1, 256>}, {pipeline_mode = #tpu.pipeline_mode<synchronous>, transform_indices = @transform_8, window_bounds = array<i64: 256, 1024>}, {pipeline_mode = #tpu.pipeline_mode<synchronous>, transform_indices = @transform_9, window_bounds = array<i64: 1, 1024>}, {transform_indices = @transform_10, window_bounds = array<i64: 16, 1024>}, {transform_indices = @transform_11, window_bounds = array<i64: 16, 128>}, {transform_indices = @transform_12, window_bounds = array<i64: 16, 128>}]} {
    %c0 = arith.constant 0 : index
    %c0_0 = arith.constant 0 : index
    %0 = vector.load %arg1[%c0, %c0_0] : memref<16x1024xf32, #tpu.memory_space<vmem>>, vector<16x1024xf32>
    %1 = arith.truncf %0 : vector<16x1024xf32> to vector<16x1024xbf16>
    %c0_1 = arith.constant 0 : index
    %c0_2 = arith.constant 0 : index
    %2 = vector.load %arg3[%c0_1, %c0_2] : memref<1024x256xbf16, #tpu.memory_space<vmem>>, vector<1024x256xbf16>
    %cst = arith.constant dense<0.000000e+00> : vector<16x256xf32>
    %3 = tpu.matmul %1, %2, %cst {dimension_numbers = #tpu.dot_dimension_numbers<[1], [0], [0], [1], [0, 0, 1, 1], [], []>} : vector<16x1024xbf16>, vector<1024x256xbf16>, vector<16x256xf32> -> vector<16x256xf32>
    %c0_3 = arith.constant 0 : index
    %c0_4 = arith.constant 0 : index
    %4 = vector.load %arg4[%c0_3, %c0_4] : memref<1x256xf32, #tpu.memory_space<vmem>>, vector<1x256xf32>
    %5 = vector.broadcast %4 : vector<1x256xf32> to vector<16x256xf32>
    %6 = arith.addf %3, %5 : vector<16x256xf32>
    %cst_5 = arith.constant 0.000000e+00 : f32
    %7 = vector.broadcast %cst_5 : f32 to vector<16x256xf32>
    %8 = arith.maximumf %6, %7 : vector<16x256xf32>
    %9 = arith.truncf %8 : vector<16x256xf32> to vector<16x256xbf16>
    %c0_6 = arith.constant 0 : index
    %c0_7 = arith.constant 0 : index
    %10 = vector.load %arg5[%c0_6, %c0_7] : memref<256x256xbf16, #tpu.memory_space<vmem>>, vector<256x256xbf16>
    %cst_8 = arith.constant dense<0.000000e+00> : vector<16x256xf32>
    %11 = tpu.matmul %9, %10, %cst_8 {dimension_numbers = #tpu.dot_dimension_numbers<[1], [0], [0], [1], [0, 0, 1, 1], [], []>} : vector<16x256xbf16>, vector<256x256xbf16>, vector<16x256xf32> -> vector<16x256xf32>
    %c0_9 = arith.constant 0 : index
    %c0_10 = arith.constant 0 : index
    %12 = vector.load %arg6[%c0_9, %c0_10] : memref<1x256xf32, #tpu.memory_space<vmem>>, vector<1x256xf32>
    %13 = vector.broadcast %12 : vector<1x256xf32> to vector<16x256xf32>
    %14 = arith.addf %11, %13 : vector<16x256xf32>
    %15 = vector.extract_strided_slice %14 {offsets = [0, 0], sizes = [16, 128], strides = [1, 1]} : vector<16x256xf32> to vector<16x128xf32>
    %16 = vector.extract_strided_slice %14 {offsets = [0, 128], sizes = [16, 128], strides = [1, 1]} : vector<16x256xf32> to vector<16x128xf32>
    %cst_11 = arith.constant 5.000000e-01 : f32
    %17 = vector.broadcast %cst_11 : f32 to vector<16x128xf32>
    %18 = arith.mulf %17, %16 : vector<16x128xf32>
    %19 = math.exp %18 : vector<16x128xf32>
    %c0_12 = arith.constant 0 : index
    %c0_13 = arith.constant 0 : index
    %20 = vector.load %arg2[%c0_12, %c0_13] : memref<16x128xf32, #tpu.memory_space<vmem>>, vector<16x128xf32>
    %21 = arith.mulf %20, %19 : vector<16x128xf32>
    %22 = arith.addf %15, %21 : vector<16x128xf32>
    %23 = arith.truncf %22 : vector<16x128xf32> to vector<16x128xbf16>
    %c0_14 = arith.constant 0 : index
    %c0_15 = arith.constant 0 : index
    %24 = vector.load %arg7[%c0_14, %c0_15] : memref<128x256xbf16, #tpu.memory_space<vmem>>, vector<128x256xbf16>
    %cst_16 = arith.constant dense<0.000000e+00> : vector<16x256xf32>
    %25 = tpu.matmul %23, %24, %cst_16 {dimension_numbers = #tpu.dot_dimension_numbers<[1], [0], [0], [1], [0, 0, 1, 1], [], []>} : vector<16x128xbf16>, vector<128x256xbf16>, vector<16x256xf32> -> vector<16x256xf32>
    %c0_17 = arith.constant 0 : index
    %c0_18 = arith.constant 0 : index
    %26 = vector.load %arg8[%c0_17, %c0_18] : memref<1x256xf32, #tpu.memory_space<vmem>>, vector<1x256xf32>
    %27 = vector.broadcast %26 : vector<1x256xf32> to vector<16x256xf32>
    %28 = arith.addf %25, %27 : vector<16x256xf32>
    %cst_19 = arith.constant 0.000000e+00 : f32
    %29 = vector.broadcast %cst_19 : f32 to vector<16x256xf32>
    %30 = arith.maximumf %28, %29 : vector<16x256xf32>
    %31 = arith.truncf %30 : vector<16x256xf32> to vector<16x256xbf16>
    %c0_20 = arith.constant 0 : index
    %c0_21 = arith.constant 0 : index
    %32 = vector.load %arg9[%c0_20, %c0_21] : memref<256x1024xbf16, #tpu.memory_space<vmem>>, vector<256x1024xbf16>
    %cst_22 = arith.constant dense<0.000000e+00> : vector<16x1024xf32>
    %33 = tpu.matmul %31, %32, %cst_22 {dimension_numbers = #tpu.dot_dimension_numbers<[1], [0], [0], [1], [0, 0, 1, 1], [], []>} : vector<16x256xbf16>, vector<256x1024xbf16>, vector<16x1024xf32> -> vector<16x1024xf32>
    %c0_23 = arith.constant 0 : index
    %c0_24 = arith.constant 0 : index
    %34 = vector.load %arg10[%c0_23, %c0_24] : memref<1x1024xf32, #tpu.memory_space<vmem>>, vector<1x1024xf32>
    %35 = vector.broadcast %34 : vector<1x1024xf32> to vector<16x1024xf32>
    %36 = arith.addf %33, %35 : vector<16x1024xf32>
    %cst_25 = arith.constant 5.000000e-01 : f32
    %37 = vector.broadcast %cst_25 : f32 to vector<16x1024xf32>
    %38 = arith.mulf %37, %36 : vector<16x1024xf32>
    %39 = math.tanh %38 : vector<16x1024xf32>
    %cst_26 = arith.constant 1.000000e+00 : f32
    %40 = vector.broadcast %cst_26 : f32 to vector<16x1024xf32>
    %41 = arith.addf %39, %40 : vector<16x1024xf32>
    %cst_27 = arith.constant 5.000000e-01 : f32
    %42 = vector.broadcast %cst_27 : f32 to vector<16x1024xf32>
    %43 = arith.mulf %42, %41 : vector<16x1024xf32>
    %c0_28 = arith.constant 0 : index
    %c0_29 = arith.constant 0 : index
    %44 = vector.load %arg11[%c0_28, %c0_29] : memref<16x1024xf32, #tpu.memory_space<vmem>>, vector<16x1024xf32>
    tpu.vector_store %arg11[%c0_28, %c0_29], %43 {strides = array<i32>} : memref<16x1024xf32, #tpu.memory_space<vmem>>, vector<16x1024xf32>,
    %c0_30 = arith.constant 0 : index
    %c0_31 = arith.constant 0 : index
    %45 = vector.load %arg12[%c0_30, %c0_31] : memref<16x128xf32, #tpu.memory_space<vmem>>, vector<16x128xf32>
    tpu.vector_store %arg12[%c0_30, %c0_31], %15 {strides = array<i32>} : memref<16x128xf32, #tpu.memory_space<vmem>>, vector<16x128xf32>,
    %c0_32 = arith.constant 0 : index
    %c0_33 = arith.constant 0 : index
    %46 = vector.load %arg13[%c0_32, %c0_33] : memref<16x128xf32, #tpu.memory_space<vmem>>, vector<16x128xf32>
    tpu.vector_store %arg13[%c0_32, %c0_33], %16 {strides = array<i32>} : memref<16x128xf32, #tpu.memory_space<vmem>>, vector<16x128xf32>,
    return
  }
  func.func @transform_0(%arg0: i32) -> (i32, i32) {
    %c0_i32 = arith.constant 0 : i32
    %c0_i32_0 = arith.constant 0 : i32
    return %arg0, %c0_i32 : i32, i32
  }
  func.func @transform_1(%arg0: i32) -> (i32, i32) {
    %c0_i32 = arith.constant 0 : i32
    %c0_i32_0 = arith.constant 0 : i32
    return %arg0, %c0_i32 : i32, i32
  }
  func.func @transform_2(%arg0: i32) -> (i32, i32) {
    %c0_i32 = arith.constant 0 : i32
    %c0_i32_0 = arith.constant 0 : i32
    %c0_i32_1 = arith.constant 0 : i32
    return %c0_i32, %c0_i32_0 : i32, i32
  }
  func.func @transform_3(%arg0: i32) -> (i32, i32) {
    %c0_i32 = arith.constant 0 : i32
    %c0_i32_0 = arith.constant 0 : i32
    %c0_i32_1 = arith.constant 0 : i32
    return %c0_i32, %c0_i32_0 : i32, i32
  }
  func.func @transform_4(%arg0: i32) -> (i32, i32) {
    %c0_i32 = arith.constant 0 : i32
    %c0_i32_0 = arith.constant 0 : i32
    %c0_i32_1 = arith.constant 0 : i32
    return %c0_i32, %c0_i32_0 : i32, i32
  }
  func.func @transform_5(%arg0: i32) -> (i32, i32) {
    %c0_i32 = arith.constant 0 : i32
    %c0_i32_0 = arith.constant 0 : i32
    %c0_i32_1 = arith.constant 0 : i32
    return %c0_i32, %c0_i32_0 : i32, i32
  }
  func.func @transform_6(%arg0: i32) -> (i32, i32) {
    %c0_i32 = arith.constant 0 : i32
    %c0_i32_0 = arith.constant 0 : i32
    %c0_i32_1 = arith.constant 0 : i32
    return %c0_i32, %c0_i32_0 : i32, i32
  }
  func.func @transform_7(%arg0: i32) -> (i32, i32) {
    %c0_i32 = arith.constant 0 : i32
    %c0_i32_0 = arith.constant 0 : i32
    %c0_i32_1 = arith.constant 0 : i32
    return %c0_i32, %c0_i32_0 : i32, i32
  }
  func.func @transform_8(%arg0: i32) -> (i32, i32) {
    %c0_i32 = arith.constant 0 : i32
    %c0_i32_0 = arith.constant 0 : i32
    %c0_i32_1 = arith.constant 0 : i32
    return %c0_i32, %c0_i32_0 : i32, i32
  }
  func.func @transform_9(%arg0: i32) -> (i32, i32) {
    %c0_i32 = arith.constant 0 : i32
    %c0_i32_0 = arith.constant 0 : i32
    %c0_i32_1 = arith.constant 0 : i32
    return %c0_i32, %c0_i32_0 : i32, i32
  }
  func.func @transform_10(%arg0: i32) -> (i32, i32) {
    %c0_i32 = arith.constant 0 : i32
    %c0_i32_0 = arith.constant 0 : i32
    return %arg0, %c0_i32 : i32, i32
  }
  func.func @transform_11(%arg0: i32) -> (i32, i32) {
    %c0_i32 = arith.constant 0 : i32
    %c0_i32_0 = arith.constant 0 : i32
    return %arg0, %c0_i32 : i32, i32
  }
  func.func @transform_12(%arg0: i32) -> (i32, i32) {
    %c0_i32 = arith.constant 0 : i32
    %c0_i32_0 = arith.constant 0 : i32
    return %arg0, %c0_i32 : i32, i32
  }
}

</mosaic_0001>

<bundles_post_ra>
// kernel: vae_forward.1
= control target key start
LH: loop header
LB: loop body
LE: loop exit
PB: predicated region body
PF: predicated region fallthrough
CT: control target
= control target key end

     0   :  { %18 = vsyncpa [#allocation3], 0  ;;  %s3650_s0 = inlined_call_operand.vmem [shape: f32[16,1024], index: 0, kind: input, shape index: {}]   ;;  %s3651_s1 = inlined_call_operand.vmem [shape: f32[16,128], index: 1, kind: input, shape index: {}]   ;;  %s3652_s2 = inlined_call_operand.hbm [shape: bf16[1024,256], index: 2, kind: input, shape index: {}]   ;;  %s3653_s3 = inlined_call_operand.vmem [shape: f32[1,256], index: 3, kind: input, shape index: {}]   ;;  %s3654_s4 = inlined_call_operand.vmem [shape: bf16[256,256], index: 4, kind: input, shape index: {}]   ;;  %s3655_s5 = inlined_call_operand.vmem [shape: f32[1,256], index: 5, kind: input, shape index: {}]   ;;  %s3656_s6 = inlined_call_operand.hbm [shape: bf16[128,256], index: 6, kind: input, shape index: {}]   ;;  %s3657_s7 = inlined_call_operand.vmem [shape: f32[1,256], index: 7, kind: input, shape index: {}]   ;;  %s3658_s8 = inlined_call_operand.hbm [shape: bf16[256,1024], index: 8, kind: input, shape index: {}]   ;;  %s3659_s9 = inlined_call_operand.vmem [shape: f32[1,1024], index: 9, kind: input, shape index: {}]   ;;  %s3660_s10 = inlined_call_operand.vmem [shape: f32[16,1024], index: 10, kind: output, shape index: {0}]   ;;  %s3661_s11 = inlined_call_operand.vmem [shape: f32[16,128], index: 11, kind: output, shape index: {1}]   ;;  %s3662_s12 = inlined_call_operand.vmem [shape: f32[16,128], index: 12, kind: output, shape index: {2}]  }
   0x1   :  { %19 = vsyncpa [#allocation5], 0  ;;  %s3257_s21 = smov [#allocation4]   ;;  %s3258_s23 = smov [#allocation2]  }
   0x2   :  { %s47_s22 = sshll.u32 %s3257_s21, 4  ;;  %s29_s24 = sshll.u32 %s3258_s23, 4  ;;  %s48_s22 = int_to_ptr.vmem [resolvable:$true] %s47_s22  ;;  %s3330_s24 = int_to_ptr.vmem [resolvable:$true] %s29_s24 }
   0x3   :  { %s3187_s27 = scalar_lea.hbm %s3656_s6, 2048 }
   0x4   :  { %p3188_p0 = scmp.ne.s32.totalorder %s3656_s6, %s3187_s27  ;;  %p3191_p1 = scmp.lt.u32.totalorder %s3187_s27, %s3656_s6 }
   0x6   :  { %p3193_p2 = pnand %p3191_p1, %p3188_p0 }
   0x8   :  { %3196 = shalt.err (!%p3193_p2)
}
   0x9   :  { %s3197_s14 = scalar_lea.vmem %s48_s22, 2048  ;;  %p3202_p4 = scmp.lt.s32.totalorder %s48_s22, %s48_s22 }
   0xa   :  { %p3198_p3 = scmp.ne.s32.totalorder %s48_s22, %s3197_s14  ;;  %p3203_p5 = scmp.lt.s32.totalorder %s3197_s14, %s3197_s14 }
   0xc   :  { %p3204_p6 = por %p3203_p5, %p3202_p4 }
   0xe   :  { %p3205_p7 = pnand %p3204_p6, %p3198_p3 }
  0x10   :  { %3208 = shalt.err (!%p3205_p7)
}
  0x11   :  { %s3259_s15 = smov 128   ;;  %s3260_s16 = smov 8  }
  0x12   :  { %53 = dma.hbm_to_vmem [thread:$0]  %s3656_s6, 2048, %s48_s22, [#allocation5], %s3259_s15, %s3259_s15, %s3260_s16  }
  0x13   :  { %s3209_s21 = scalar_lea.hbm %s3652_s2, 16384 }
  0x14   :  { %p3210_p8 = scmp.ne.s32.totalorder %s3652_s2, %s3209_s21  ;;  %p3213_p9 = scmp.lt.u32.totalorder %s3209_s21, %s3652_s2 }
  0x16   :  { %p3215_p10 = pnand %p3213_p9, %p3210_p8 }
  0x18   :  { %3218 = shalt.err (!%p3215_p10)
}
  0x19   :  { %s3219_s28 = scalar_lea.vmem %s3330_s24, 16384  ;;  %p3224_p12 = scmp.lt.s32.totalorder %s3330_s24, %s3330_s24 }
  0x1a   :  { %p3220_p11 = scmp.ne.s32.totalorder %s3330_s24, %s3219_s28  ;;  %p3225_p13 = scmp.lt.s32.totalorder %s3219_s28, %s3219_s28 }
  0x1c   :  { %p3226_p0 = por %p3225_p13, %p3224_p12 }
  0x1e   :  { %p3227_p1 = pnand %p3226_p0, %p3220_p11 }
  0x20   :  { %3230 = shalt.err (!%p3227_p1)
}
  0x21   :  { %35 = dma.hbm_to_vmem [thread:$0]  %s3652_s2, 16384, %s3330_s24, [#allocation3], %s3259_s15, %s3259_s15, %s3260_s16  }
  0x22   :  { %s3261_s29 = smov [#allocation6]   ;;  %s3231_s17 = scalar_lea.hbm %s3658_s8, 16384 }
  0x23   :  { %s61_s30 = sshll.u32 %s3261_s29, 4  ;;  %p3232_p2 = scmp.ne.s32.totalorder %s3658_s8, %s3231_s17  ;;  %s62_s30 = int_to_ptr.vmem [resolvable:$true] %s61_s30 }
  0x24   :  { %p3235_p3 = scmp.lt.u32.totalorder %s3231_s17, %s3658_s8 }
  0x26   :  { %p3237_p4 = pnand %p3235_p3, %p3232_p2 }
  0x28   :  { %3240 = shalt.err (!%p3237_p4)
}
  0x29   :  { %s3241_s23 = scalar_lea.vmem %s62_s30, 16384  ;;  %p3246_p6 = scmp.lt.s32.totalorder %s62_s30, %s62_s30 }
  0x2a   :  { %p3242_p5 = scmp.ne.s32.totalorder %s62_s30, %s3241_s23  ;;  %p3247_p7 = scmp.lt.s32.totalorder %s3241_s23, %s3241_s23 }
  0x2c   :  { %p3248_p8 = por %p3247_p7, %p3246_p6 }
  0x2e   :  { %p3249_p9 = pnand %p3248_p8, %p3242_p5 }
  0x30   :  { %3252 = shalt.err (!%p3249_p9)
}
  0x31   :  { %s3262_s2 = smov 512   ;;  %s3263_s24 = smov 32  }
  0x32   :  { %67 = dma.hbm_to_vmem [thread:$0]  %s3658_s8, 16384, %s62_s30, [#allocation5], %s3262_s2, %s3262_s2, %s3263_s24  }
  0x33   :  { %3253 = dma.done.wait [#allocation3], 16384  }
  0x34   :  { %3254 = vsyncadd [#allocation3], 4294950912 }
  0x35   :  { %3255 = dma.done.wait [#allocation5], 18432  }
  0x36   :  { %3256 = vsyncadd [#allocation5], 4294948864  ;;  %v2887_v0 = vld [vmem:[#allocation2 + $0x4] ss:$8 sps:$4 sm:$0xff]   ;;  %v2889_v1 = vld [vmem:[#allocation2] ss:$8 sps:$4 sm:$0xff]  }
  0x37   :  { %884 = vmatprep.subr.bf16.mxu0 %v2887_v0  ;;  %v2890_v2 = vld [vmem:[#allocation2 + $0x14] ss:$8 sps:$4 sm:$0xff]   ;;  %v2892_v3 = vld [vmem:[#allocation2 + $0x10] ss:$8 sps:$4 sm:$0xff]   ;;  %v2893_v4 = vld [vmem:[#allocation2 + $0x24] ss:$8 sps:$4 sm:$0xff]  }
  0x38   :  { %885 = vmatpush1.bf16.msra.mxu0 %v2889_v1  ;;  %v2895_v5 = vld [vmem:[#allocation2 + $0x20] ss:$8 sps:$4 sm:$0xff]   ;;  %v2896_v6 = vld [vmem:[#allocation2 + $0x34] ss:$8 sps:$4 sm:$0xff]   ;;  %v2898_v7 = vld [vmem:[#allocation2 + $0x30] ss:$8 sps:$4 sm:$0xff]  }
  0x39   :  { %886 = vmatprep.subr.bf16.mxu0 %v2890_v2  ;;  %v2899_v8 = vld [vmem:[#allocation2 + $0x44] ss:$8 sps:$4 sm:$0xff]   ;;  %v2901_v9 = vld [vmem:[#allocation2 + $0x40] ss:$8 sps:$4 sm:$0xff]   ;;  %v2902_v10 = vld [vmem:[#allocation2 + $0x54] ss:$8 sps:$4 sm:$0xff]  }
  0x3a   :  { %v2904_v11 = vld [vmem:[#allocation2 + $0x50] ss:$8 sps:$4 sm:$0xff]   ;;  %v2905_v12 = vld [vmem:[#allocation2 + $0x64] ss:$8 sps:$4 sm:$0xff]   ;;  %v2907_v16 = vld [vmem:[#allocation2 + $0x60] ss:$8 sps:$4 sm:$0xff]  }
  0x3b   :  { %v81_v13 = vld [vmem:[%s3650_s0 + $0x8] sm:$0xff]  ;;  %v2908_v17 = vld [vmem:[#allocation2 + $0x74] ss:$8 sps:$4 sm:$0xff]   ;;  %v2910_v18 = vld [vmem:[#allocation2 + $0x70] ss:$8 sps:$4 sm:$0xff]  }
  0x3c   :  { %887 = vmatpush1.bf16.msra.mxu0 %v2892_v3  ;;  %v89_v14 = vld [vmem:[%s3650_s0 + $0x48] sm:$0xff]  ;;  %v2914_v21 = vld [vmem:[#allocation2 + $0x94] ss:$8 sps:$4 sm:$0xff]   ;;  %v2916_v22 = vld [vmem:[#allocation2 + $0x90] ss:$8 sps:$4 sm:$0xff]  }
  0x3d   :  { %888 = vmatprep.subr.bf16.mxu0 %v2893_v4  ;;  %v97_v15 = vpack.c.bf16 %v89_v14, %v81_v13  ;;  %v2911_v19 = vld [vmem:[#allocation2 + $0x84] ss:$8 sps:$4 sm:$0xff]   ;;  %v2913_v20 = vld [vmem:[#allocation2 + $0x80] ss:$8 sps:$4 sm:$0xff]   ;;  %v2920_v25 = vld [vmem:[#allocation2 + $0xb4] ss:$8 sps:$4 sm:$0xff]  }
  0x3e   :  { %v2917_v23 = vld [vmem:[#allocation2 + $0xa4] ss:$8 sps:$4 sm:$0xff]   ;;  %v2919_v24 = vld [vmem:[#allocation2 + $0xa0] ss:$8 sps:$4 sm:$0xff]   ;;  %v2922_v26 = vld [vmem:[#allocation2 + $0xb0] ss:$8 sps:$4 sm:$0xff]  }
  0x3f   :  { %916 = vmatprep.mubr.bf16.mxu0 %v97_v15  ;;  %v2923_v27 = vld [vmem:[#allocation2 + $0xc4] ss:$8 sps:$4 sm:$0xff]   ;;  %v2925_v28 = vld [vmem:[#allocation2 + $0xc0] ss:$8 sps:$4 sm:$0xff]   ;;  %v2926_v29 = vld [vmem:[#allocation2 + $0xd4] ss:$8 sps:$4 sm:$0xff]  }
  0x40   :  { %889 = vmatpush1.bf16.msra.mxu0 %v2895_v5  ;;  %v2928_v30 = vld [vmem:[#allocation2 + $0xd0] ss:$8 sps:$4 sm:$0xff]   ;;  %v2929_v31 = vld [vmem:[#allocation2 + $0xe4] ss:$8 sps:$4 sm:$0xff]   ;;  %v2931_v32 = vld [vmem:[#allocation2 + $0xe0] ss:$8 sps:$4 sm:$0xff]  }
  0x41   :  { %890 = vmatprep.subr.bf16.mxu0 %v2896_v6  ;;  %v2932_v33 = vld [vmem:[#allocation2 + $0xf4] ss:$8 sps:$4 sm:$0xff]   ;;  %v2934_v34 = vld [vmem:[#allocation2 + $0xf0] ss:$8 sps:$4 sm:$0xff]   ;;  %v2937_v35 = vld [vmem:[#allocation2 + $0x104] ss:$8 sps:$4 sm:$0xff]  }
  0x42   :  { %v80_v36 = vld [vmem:[%s3650_s0] sm:$0xff]  ;;  %v83_v38 = vld [vmem:[%s3650_s0 + $0x18] sm:$0xff]  ;;  %v93_v13 = vld [vmem:[%s3650_s0 + $0x68] sm:$0xff] }
  0x43   :  { %v88_v37 = vld [vmem:[%s3650_s0 + $0x40] sm:$0xff]  ;;  %v91_v39 = vld [vmem:[%s3650_s0 + $0x58] sm:$0xff] }
  0x44   :  { %891 = vmatpush1.bf16.msra.mxu0 %v2898_v7  ;;  %v96_v40 = vpack.c.bf16 %v88_v37, %v80_v36  ;;  %v2935_v41 = vld [vmem:[#allocation2 + $0x100] ss:$8 sps:$4 sm:$0xff]   ;;  %v99_v42 = vpack.c.bf16 %v91_v39, %v83_v38  ;;  %v2940_v43 = vld [vmem:[#allocation2 + $0x114] ss:$8 sps:$4 sm:$0xff]   ;;  %v2938_v44 = vld [vmem:[#allocation2 + $0x110] ss:$8 sps:$4 sm:$0xff]  }
  0x45   :  { %892 = vmatprep.subr.bf16.mxu0 %v2899_v8  ;;  %v2943_v45 = vld [vmem:[#allocation2 + $0x124] ss:$8 sps:$4 sm:$0xff]   ;;  %v2941_v46 = vld [vmem:[#allocation2 + $0x120] ss:$8 sps:$4 sm:$0xff]   ;;  %v2946_v47 = vld [vmem:[#allocation2 + $0x134] ss:$8 sps:$4 sm:$0xff]  }
  0x46   :  { %v2944_v48 = vld [vmem:[#allocation2 + $0x130] ss:$8 sps:$4 sm:$0xff]   ;;  %v2949_v49 = vld [vmem:[#allocation2 + $0x144] ss:$8 sps:$4 sm:$0xff]   ;;  %v2947_v50 = vld [vmem:[#allocation2 + $0x140] ss:$8 sps:$4 sm:$0xff]  }
  0x47   :  { %v2952_v51 = vld [vmem:[#allocation2 + $0x154] ss:$8 sps:$4 sm:$0xff]   ;;  %v2950_v52 = vld [vmem:[#allocation2 + $0x150] ss:$8 sps:$4 sm:$0xff]   ;;  %v2955_v53 = vld [vmem:[#allocation2 + $0x164] ss:$8 sps:$4 sm:$0xff]  }
  0x48   :  { %893 = vmatpush1.bf16.msra.mxu0 %v2901_v9  ;;  %v2953_v54 = vld [vmem:[#allocation2 + $0x160] ss:$8 sps:$4 sm:$0xff]   ;;  %v2958_v55 = vld [vmem:[#allocation2 + $0x174] ss:$8 sps:$4 sm:$0xff]   ;;  %v2956_v56 = vld [vmem:[#allocation2 + $0x170] ss:$8 sps:$4 sm:$0xff]  }
  0x49   :  { %894 = vmatprep.subr.bf16.mxu0 %v2902_v10  ;;  %v2961_v57 = vld [vmem:[#allocation2 + $0x184] ss:$8 sps:$4 sm:$0xff]   ;;  %v2959_v58 = vld [vmem:[#allocation2 + $0x180] ss:$8 sps:$4 sm:$0xff]   ;;  %v2964_v59 = vld [vmem:[#allocation2 + $0x194] ss:$8 sps:$4 sm:$0xff]  }
  0x4a   :  { %v2962_v60 = vld [vmem:[#allocation2 + $0x190] ss:$8 sps:$4 sm:$0xff]   ;;  %v2967_v61 = vld [vmem:[#allocation2 + $0x1a4] ss:$8 sps:$4 sm:$0xff]   ;;  %v2965_v62 = vld [vmem:[#allocation2 + $0x1a0] ss:$8 sps:$4 sm:$0xff]  }
  0x4b   :  { %v2970_v63 = vld [vmem:[#allocation2 + $0x1b4] ss:$8 sps:$4 sm:$0xff]   ;;  %v2968_v0 = vld [vmem:[#allocation2 + $0x1b0] ss:$8 sps:$4 sm:$0xff]   ;;  %v2973_v1 = vld [vmem:[#allocation2 + $0x1c4] ss:$8 sps:$4 sm:$0xff]  }
  0x4c   :  { %895 = vmatpush1.bf16.msra.mxu0 %v2904_v11  ;;  %v2971_v2 = vld [vmem:[#allocation2 + $0x1c0] ss:$8 sps:$4 sm:$0xff]   ;;  %v2976_v3 = vld [vmem:[#allocation2 + $0x1d4] ss:$8 sps:$4 sm:$0xff]   ;;  %v2974_v4 = vld [vmem:[#allocation2 + $0x1d0] ss:$8 sps:$4 sm:$0xff]  }
  0x4d   :  { %896 = vmatprep.subr.bf16.mxu0 %v2905_v12  ;;  %v2979_v5 = vld [vmem:[#allocation2 + $0x1e4] ss:$8 sps:$4 sm:$0xff]   ;;  %v2977_v6 = vld [vmem:[#allocation2 + $0x1e0] ss:$8 sps:$4 sm:$0xff]   ;;  %v2982_v7 = vld [vmem:[#allocation2 + $0x1f4] ss:$8 sps:$4 sm:$0xff]  }
  0x4e   :  { %v2980_v8 = vld [vmem:[#allocation2 + $0x1f0] ss:$8 sps:$4 sm:$0xff]   ;;  %v2985_v11 = vld [vmem:[#allocation2 + $0x204] ss:$8 sps:$4 sm:$0xff]   ;;  %v2983_v15 = vld [vmem:[#allocation2 + $0x200] ss:$8 sps:$4 sm:$0xff]  }
  0x4f   :  { %v82_v9 = vld [vmem:[%s3650_s0 + $0x10] sm:$0xff]  ;;  %v85_v12 = vld [vmem:[%s3650_s0 + $0x28] sm:$0xff] }
  0x50   :  { %897 = vmatpush1.bf16.msra.mxu0 %v2907_v16  ;;  %v90_v10 = vld [vmem:[%s3650_s0 + $0x50] sm:$0xff]  ;;  %v101_v16 = vpack.c.bf16 %v93_v13, %v85_v12  ;;  %v3003_v38 = vld [vmem:[#allocation2 + $0x264] ss:$8 sps:$4 sm:$0xff]   ;;  %v87_v13 = vld [vmem:[%s3650_s0 + $0x38] sm:$0xff] }
  0x51   :  { %898 = vmatprep.subr.bf16.mxu0 %v2908_v17  ;;  %v98_v14 = vpack.c.bf16 %v90_v10, %v82_v9  ;;  %v2988_v17 = vld [vmem:[#allocation2 + $0x214] ss:$8 sps:$4 sm:$0xff]   ;;  %v2998_v37 = vld [vmem:[#allocation2 + $0x250] ss:$8 sps:$4 sm:$0xff]   ;;  %v84_v10 = vld [vmem:[%s3650_s0 + $0x20] sm:$0xff] }
  0x52   :  { %v3094_v36 = vld [vmem:[%s3654_s4 + $0x54] ss:$8 sps:$4 sm:$0xff]   ;;  %v3096_v39 = vld [vmem:[%s3654_s4 + $0x50] ss:$8 sps:$4 sm:$0xff]   ;;  %v3033_v12 = vld [vmem:[#allocation2 + $0x304] ss:$8 sps:$4 sm:$0xff]  }
  0x53   :  { %v3028_v9 = vld [vmem:[#allocation2 + $0x2f0] ss:$8 sps:$4 sm:$0xff]  }
  0x54   :  { %899 = vmatpush1.bf16.msra.mxu0 %v2910_v18  ;;  %v3079_v18 = vld [vmem:[%s3654_s4 + $0x4] ss:$8 sps:$4 sm:$0xff]  }
  0x55   :  { %900 = vmatprep.subr.bf16.mxu0 %v2911_v19  ;;  %v3081_v19 = vld [vmem:[%s3654_s4] ss:$8 sps:$4 sm:$0xff]   ;;  %1266 = vmatprep.subr.bf16.mxu1 %v3079_v18  ;;  %v3036_v18 = vld [vmem:[#allocation2 + $0x314] ss:$8 sps:$4 sm:$0xff]  }
  0x56   :  { %1267 = vmatpush1.bf16.msra.mxu1 %v3081_v19  ;;  %v3034_v19 = vld [vmem:[#allocation2 + $0x310] ss:$8 sps:$4 sm:$0xff]  }
  0x58   :  { %901 = vmatpush1.bf16.msra.mxu0 %v2913_v20  ;;  %v3082_v20 = vld [vmem:[%s3654_s4 + $0x14] ss:$8 sps:$4 sm:$0xff]  }
  0x59   :  { %902 = vmatprep.subr.bf16.mxu0 %v2914_v21  ;;  %v2986_v21 = vld [vmem:[#allocation2 + $0x210] ss:$8 sps:$4 sm:$0xff]   ;;  %1268 = vmatprep.subr.bf16.mxu1 %v3082_v20  ;;  %v3039_v20 = vld [vmem:[#allocation2 + $0x324] ss:$8 sps:$4 sm:$0xff]  }
  0x5c   :  { %903 = vmatpush1.bf16.msra.mxu0 %v2916_v22  ;;  %v2991_v22 = vld [vmem:[#allocation2 + $0x224] ss:$8 sps:$4 sm:$0xff]  }
  0x5d   :  { %904 = vmatprep.subr.bf16.mxu0 %v2917_v23  ;;  %v3084_v23 = vld [vmem:[%s3654_s4 + $0x10] ss:$8 sps:$4 sm:$0xff]  }
  0x5e   :  { %1269 = vmatpush1.bf16.msra.mxu1 %v3084_v23  ;;  %v3040_v23 = vld [vmem:[#allocation2 + $0x330] ss:$8 sps:$4 sm:$0xff]  }
  0x60   :  { %905 = vmatpush1.bf16.msra.mxu0 %v2919_v24  ;;  %v3085_v24 = vld [vmem:[%s3654_s4 + $0x24] ss:$8 sps:$4 sm:$0xff]  }
  0x61   :  { %906 = vmatprep.subr.bf16.mxu0 %v2920_v25  ;;  %v2989_v25 = vld [vmem:[#allocation2 + $0x220] ss:$8 sps:$4 sm:$0xff]   ;;  %1270 = vmatprep.subr.bf16.mxu1 %v3085_v24  ;;  %v3045_v24 = vld [vmem:[#allocation2 + $0x344] ss:$8 sps:$4 sm:$0xff]  }
  0x64   :  { %907 = vmatpush1.bf16.msra.mxu0 %v2922_v26  ;;  %v2994_v26 = vld [vmem:[#allocation2 + $0x234] ss:$8 sps:$4 sm:$0xff]  }
  0x65   :  { %908 = vmatprep.subr.bf16.mxu0 %v2923_v27  ;;  %v3087_v27 = vld [vmem:[%s3654_s4 + $0x20] ss:$8 sps:$4 sm:$0xff]  }
  0x66   :  { %1271 = vmatpush1.bf16.msra.mxu1 %v3087_v27  ;;  %v3046_v27 = vld [vmem:[#allocation2 + $0x350] ss:$8 sps:$4 sm:$0xff]  }
  0x68   :  { %909 = vmatpush1.bf16.msra.mxu0 %v2925_v28  ;;  %v3088_v28 = vld [vmem:[%s3654_s4 + $0x34] ss:$8 sps:$4 sm:$0xff]  }
  0x69   :  { %910 = vmatprep.subr.bf16.mxu0 %v2926_v29  ;;  %v2992_v29 = vld [vmem:[#allocation2 + $0x230] ss:$8 sps:$4 sm:$0xff]   ;;  %1272 = vmatprep.subr.bf16.mxu1 %v3088_v28  ;;  %v3051_v28 = vld [vmem:[#allocation2 + $0x364] ss:$8 sps:$4 sm:$0xff]  }
  0x6c   :  { %911 = vmatpush1.bf16.msra.mxu0 %v2928_v30  ;;  %v2997_v30 = vld [vmem:[#allocation2 + $0x244] ss:$8 sps:$4 sm:$0xff]  }
  0x6d   :  { %912 = vmatprep.subr.bf16.mxu0 %v2929_v31  ;;  %v3090_v31 = vld [vmem:[%s3654_s4 + $0x30] ss:$8 sps:$4 sm:$0xff]  }
  0x6e   :  { %1273 = vmatpush1.bf16.msra.mxu1 %v3090_v31  ;;  %v3052_v31 = vld [vmem:[#allocation2 + $0x370] ss:$8 sps:$4 sm:$0xff]  }
  0x70   :  { %913 = vmatpush1.bf16.msra.mxu0 %v2931_v32  ;;  %v3091_v32 = vld [vmem:[%s3654_s4 + $0x44] ss:$8 sps:$4 sm:$0xff]  }
  0x71   :  { %914 = vmatprep.subr.bf16.mxu0 %v2932_v33  ;;  %v2995_v33 = vld [vmem:[#allocation2 + $0x240] ss:$8 sps:$4 sm:$0xff]   ;;  %1274 = vmatprep.subr.bf16.mxu1 %v3091_v32  ;;  %v3057_v32 = vld [vmem:[#allocation2 + $0x384] ss:$8 sps:$4 sm:$0xff]  }
  0x74   :  { %915 = vmatpush1.bf16.msra.mxu0 %v2934_v34  ;;  %v3000_v34 = vld [vmem:[#allocation2 + $0x254] ss:$8 sps:$4 sm:$0xff]  }
  0x75   :  { %927 = vmatprep.subr.bf16.mxu0 %v2937_v35  ;;  %v3093_v35 = vld [vmem:[%s3654_s4 + $0x40] ss:$8 sps:$4 sm:$0xff]  }
  0x76   :  { %1275 = vmatpush1.bf16.msra.mxu1 %v3093_v35  ;;  %v3058_v35 = vld [vmem:[#allocation2 + $0x390] ss:$8 sps:$4 sm:$0xff]  }
  0x77   :  { %917 = vmatmul.mubr.bf16.vlgmr.msra.gmra.mrb[0].mxu0 %v96_v40  ;;  %1276 = vmatprep.subr.bf16.mxu1 %v3094_v36  ;;  %v3097_v40 = vld [vmem:[%s3654_s4 + $0x64] ss:$8 sps:$4 sm:$0xff]  }
  0x78   :  { %928 = vmatpush1.bf16.msra.mxu0 %v2935_v41  ;;  %959 = vmatprep.mubr.bf16.mxu0 %v99_v42  ;;  %v3001_v41 = vld [vmem:[#allocation2 + $0x260] ss:$8 sps:$4 sm:$0xff]   ;;  %v3006_v42 = vld [vmem:[#allocation2 + $0x274] ss:$8 sps:$4 sm:$0xff]   ;;  %v3063_v36 = vld [vmem:[#allocation2 + $0x3a4] ss:$8 sps:$4 sm:$0xff]  }
  0x79   :  { %929 = vmatprep.subr.bf16.mxu0 %v2940_v43  ;;  %v3099_v43 = vld [vmem:[%s3654_s4 + $0x60] ss:$8 sps:$4 sm:$0xff]  }
  0x7a   :  { %1277 = vmatpush1.bf16.msra.mxu1 %v3096_v39  ;;  %v3064_v39 = vld [vmem:[#allocation2 + $0x3b0] ss:$8 sps:$4 sm:$0xff]  }
  0x7b   :  { %1278 = vmatprep.subr.bf16.mxu1 %v3097_v40  ;;  %v3069_v40 = vld [vmem:[#allocation2 + $0x3c4] ss:$8 sps:$4 sm:$0xff]  }
  0x7c   :  { %930 = vmatpush1.bf16.msra.mxu0 %v2938_v44  ;;  %v3100_v44 = vld [vmem:[%s3654_s4 + $0x74] ss:$8 sps:$4 sm:$0xff]  }
  0x7d   :  { %931 = vmatprep.subr.bf16.mxu0 %v2943_v45  ;;  %v3004_v45 = vld [vmem:[#allocation2 + $0x270] ss:$8 sps:$4 sm:$0xff]  }
  0x7e   :  { %1279 = vmatpush1.bf16.msra.mxu1 %v3099_v43  ;;  %v3070_v43 = vld [vmem:[#allocation2 + $0x3d0] ss:$8 sps:$4 sm:$0xff]  }
  0x7f   :  { %1280 = vmatprep.subr.bf16.mxu1 %v3100_v44  ;;  %v3075_v44 = vld [vmem:[#allocation2 + $0x3e4] ss:$8 sps:$4 sm:$0xff]  }
  0x80   :  { %932 = vmatpush1.bf16.msra.mxu0 %v2941_v46  ;;  %v3009_v46 = vld [vmem:[#allocation2 + $0x284] ss:$8 sps:$4 sm:$0xff]  }
  0x81   :  { %933 = vmatprep.subr.bf16.mxu0 %v2946_v47  ;;  %v3102_v47 = vld [vmem:[%s3654_s4 + $0x70] ss:$8 sps:$4 sm:$0xff]  }
  0x82   :  { %1281 = vmatpush1.bf16.msra.mxu1 %v3102_v47  ;;  %v3076_v47 = vld [vmem:[#allocation2 + $0x3f0] ss:$8 sps:$4 sm:$0xff]  }
  0x84   :  { %934 = vmatpush1.bf16.msra.mxu0 %v2944_v48  ;;  %v3103_v48 = vld [vmem:[%s3654_s4 + $0x84] ss:$8 sps:$4 sm:$0xff]  }
  0x85   :  { %935 = vmatprep.subr.bf16.mxu0 %v2949_v49  ;;  %v3007_v49 = vld [vmem:[#allocation2 + $0x280] ss:$8 sps:$4 sm:$0xff]   ;;  %1282 = vmatprep.subr.bf16.mxu1 %v3103_v48  ;;  %v86_v48 = vld [vmem:[%s3650_s0 + $0x30] sm:$0xff] }
  0x88   :  { %936 = vmatpush1.bf16.msra.mxu0 %v2947_v50  ;;  %v3012_v50 = vld [vmem:[#allocation2 + $0x294] ss:$8 sps:$4 sm:$0xff]  }
  0x89   :  { %937 = vmatprep.subr.bf16.mxu0 %v2952_v51  ;;  %v3105_v51 = vld [vmem:[%s3654_s4 + $0x80] ss:$8 sps:$4 sm:$0xff]  }
  0x8a   :  { %1283 = vmatpush1.bf16.msra.mxu1 %v3105_v51  ;;  %v3120_v51 = vld [vmem:[%s3654_s4 + $0xd0] ss:$8 sps:$4 sm:$0xff]  }
  0x8c   :  { %938 = vmatpush1.bf16.msra.mxu0 %v2950_v52  ;;  %v3106_v52 = vld [vmem:[%s3654_s4 + $0x94] ss:$8 sps:$4 sm:$0xff]  }
  0x8d   :  { %939 = vmatprep.subr.bf16.mxu0 %v2955_v53  ;;  %v3010_v53 = vld [vmem:[#allocation2 + $0x290] ss:$8 sps:$4 sm:$0xff]   ;;  %1284 = vmatprep.subr.bf16.mxu1 %v3106_v52  ;;  %v3121_v52 = vld [vmem:[%s3654_s4 + $0xe4] ss:$8 sps:$4 sm:$0xff]  }
  0x90   :  { %940 = vmatpush1.bf16.msra.mxu0 %v2953_v54  ;;  %v3015_v54 = vld [vmem:[#allocation2 + $0x2a4] ss:$8 sps:$4 sm:$0xff]  }
  0x91   :  { %941 = vmatprep.subr.bf16.mxu0 %v2958_v55  ;;  %v3108_v55 = vld [vmem:[%s3654_s4 + $0x90] ss:$8 sps:$4 sm:$0xff]  }
  0x92   :  { %1285 = vmatpush1.bf16.msra.mxu1 %v3108_v55  ;;  %v3126_v55 = vld [vmem:[%s3654_s4 + $0xf0] ss:$8 sps:$4 sm:$0xff]  }
  0x94   :  { %942 = vmatpush1.bf16.msra.mxu0 %v2956_v56  ;;  %v3109_v56 = vld [vmem:[%s3654_s4 + $0xa4] ss:$8 sps:$4 sm:$0xff]  }
  0x95   :  { %943 = vmatprep.subr.bf16.mxu0 %v2961_v57  ;;  %v3013_v57 = vld [vmem:[#allocation2 + $0x2a0] ss:$8 sps:$4 sm:$0xff]   ;;  %1286 = vmatprep.subr.bf16.mxu1 %v3109_v56  ;;  %v3129_v56 = vld [vmem:[#allocation4 + $0x4] ss:$8 sps:$4 sm:$0xff]  }
  0x98   :  { %944 = vmatpush1.bf16.msra.mxu0 %v2959_v58  ;;  %v3018_v58 = vld [vmem:[#allocation2 + $0x2b4] ss:$8 sps:$4 sm:$0xff]  }
  0x99   :  { %945 = vmatprep.subr.bf16.mxu0 %v2964_v59  ;;  %v3111_v59 = vld [vmem:[%s3654_s4 + $0xa0] ss:$8 sps:$4 sm:$0xff]  }
  0x9a   :  { %1287 = vmatpush1.bf16.msra.mxu1 %v3111_v59 }
  0x9c   :  { %946 = vmatpush1.bf16.msra.mxu0 %v2962_v60  ;;  %v3112_v60 = vld [vmem:[%s3654_s4 + $0xb4] ss:$8 sps:$4 sm:$0xff]  }
  0x9d   :  { %947 = vmatprep.subr.bf16.mxu0 %v2967_v61  ;;  %v3016_v61 = vld [vmem:[#allocation2 + $0x2b0] ss:$8 sps:$4 sm:$0xff]   ;;  %1288 = vmatprep.subr.bf16.mxu1 %v3112_v60  ;;  %v232_v60 = vld [vmem:[%s3653_s3] sm:$0x3] }
  0xa0   :  { %948 = vmatpush1.bf16.msra.mxu0 %v2965_v62  ;;  %v3021_v62 = vld [vmem:[#allocation2 + $0x2c4] ss:$8 sps:$4 sm:$0xff]  }
  0xa1   :  { %949 = vmatprep.subr.bf16.mxu0 %v2970_v63  ;;  %v3114_v63 = vld [vmem:[%s3654_s4 + $0xb0] ss:$8 sps:$4 sm:$0xff]  }
  0xa2   :  { %1289 = vmatpush1.bf16.msra.mxu1 %v3114_v63 }
  0xa4   :  { %950 = vmatpush1.bf16.msra.mxu0 %v2968_v0  ;;  %v3115_v0 = vld [vmem:[%s3654_s4 + $0xc4] ss:$8 sps:$4 sm:$0xff]  }
  0xa5   :  { %951 = vmatprep.subr.bf16.mxu0 %v2973_v1  ;;  %v3019_v1 = vld [vmem:[#allocation2 + $0x2c0] ss:$8 sps:$4 sm:$0xff]   ;;  %1290 = vmatprep.subr.bf16.mxu1 %v3115_v0 }
  0xa8   :  { %952 = vmatpush1.bf16.msra.mxu0 %v2971_v2  ;;  %v3024_v2 = vld [vmem:[#allocation2 + $0x2d4] ss:$8 sps:$4 sm:$0xff]  }
  0xa9   :  { %953 = vmatprep.subr.bf16.mxu0 %v2976_v3  ;;  %v3117_v3 = vld [vmem:[%s3654_s4 + $0xc0] ss:$8 sps:$4 sm:$0xff]  }
  0xaa   :  { %1291 = vmatpush1.bf16.msra.mxu1 %v3117_v3 }
  0xac   :  { %954 = vmatpush1.bf16.msra.mxu0 %v2974_v4  ;;  %v3118_v4 = vld [vmem:[%s3654_s4 + $0xd4] ss:$8 sps:$4 sm:$0xff]  }
  0xad   :  { %955 = vmatprep.subr.bf16.mxu0 %v2979_v5  ;;  %v3022_v5 = vld [vmem:[#allocation2 + $0x2d0] ss:$8 sps:$4 sm:$0xff]   ;;  %1292 = vmatprep.subr.bf16.mxu1 %v3118_v4 }
  0xae   :  { %1293 = vmatpush1.bf16.msra.mxu1 %v3120_v51  ;;  %v1518_v51 = vld [vmem:[#allocation6 + $0x138] sm:$0xff] }
  0xaf   :  { %1294 = vmatprep.subr.bf16.mxu1 %v3121_v52 }
  0xb0   :  { %956 = vmatpush1.bf16.msra.mxu0 %v2977_v6  ;;  %v3027_v6 = vld [vmem:[#allocation2 + $0x2e4] ss:$8 sps:$4 sm:$0xff]  }
  0xb1   :  { %957 = vmatprep.subr.bf16.mxu0 %v2982_v7  ;;  %v3025_v7 = vld [vmem:[#allocation2 + $0x2e0] ss:$8 sps:$4 sm:$0xff]  }
  0xb4   :  { %958 = vmatpush1.bf16.msra.mxu0 %v2980_v8  ;;  %v3030_v8 = vld [vmem:[#allocation2 + $0x2f4] ss:$8 sps:$4 sm:$0xff]  }
  0xb5   :  { %970 = vmatprep.subr.bf16.mxu0 %v2985_v11  ;;  %v92_v11 = vld [vmem:[%s3650_s0 + $0x60] sm:$0xff] }
  0xb7   :  { %960 = vmatmul.mubr.bf16.vlgmr.msra.gmra.mrb[0].mxu0 %v98_v14  ;;  %v95_v14 = vld [vmem:[%s3650_s0 + $0x78] sm:$0xff] }
  0xb8   :  { %971 = vmatpush1.bf16.msra.mxu0 %v2983_v15  ;;  %1002 = vmatprep.mubr.bf16.mxu0 %v101_v16  ;;  %v100_v15 = vpack.c.bf16 %v92_v11, %v84_v10  ;;  %v3031_v16 = vld [vmem:[#allocation2 + $0x300] ss:$8 sps:$4 sm:$0xff]  }
  0xb9   :  { %972 = vmatprep.subr.bf16.mxu0 %v2988_v17  ;;  %v103_v17 = vpack.c.bf16 %v95_v14, %v87_v13  ;;  %v3127_v14 = vld [vmem:[#allocation4] ss:$8 sps:$4 sm:$0xff]  }
  0xbc   :  { %973 = vmatpush1.bf16.msra.mxu0 %v2986_v21  ;;  %v3037_v21 = vld [vmem:[#allocation2 + $0x320] ss:$8 sps:$4 sm:$0xff]  }
  0xbd   :  { %974 = vmatprep.subr.bf16.mxu0 %v2991_v22  ;;  %v3042_v22 = vld [vmem:[#allocation2 + $0x334] ss:$8 sps:$4 sm:$0xff]  }
  0xc0   :  { %975 = vmatpush1.bf16.msra.mxu0 %v2989_v25  ;;  %v3043_v25 = vld [vmem:[#allocation2 + $0x340] ss:$8 sps:$4 sm:$0xff]  }
  0xc1   :  { %976 = vmatprep.subr.bf16.mxu0 %v2994_v26  ;;  %v3048_v26 = vld [vmem:[#allocation2 + $0x354] ss:$8 sps:$4 sm:$0xff]  }
  0xc4   :  { %977 = vmatpush1.bf16.msra.mxu0 %v2992_v29  ;;  %v3049_v29 = vld [vmem:[#allocation2 + $0x360] ss:$8 sps:$4 sm:$0xff]  }
  0xc5   :  { %978 = vmatprep.subr.bf16.mxu0 %v2997_v30  ;;  %v3054_v30 = vld [vmem:[#allocation2 + $0x374] ss:$8 sps:$4 sm:$0xff]  }
  0xc8   :  { %979 = vmatpush1.bf16.msra.mxu0 %v2995_v33  ;;  %v3055_v33 = vld [vmem:[#allocation2 + $0x380] ss:$8 sps:$4 sm:$0xff]  }
  0xc9   :  { %980 = vmatprep.subr.bf16.mxu0 %v3000_v34  ;;  %v3060_v34 = vld [vmem:[#allocation2 + $0x394] ss:$8 sps:$4 sm:$0xff]  }
  0xcc   :  { %981 = vmatpush1.bf16.msra.mxu0 %v2998_v37  ;;  %v3061_v37 = vld [vmem:[#allocation2 + $0x3a0] ss:$8 sps:$4 sm:$0xff]  }
  0xcd   :  { %982 = vmatprep.subr.bf16.mxu0 %v3003_v38  ;;  %v3066_v38 = vld [vmem:[#allocation2 + $0x3b4] ss:$8 sps:$4 sm:$0xff]  }
  0xd0   :  { %983 = vmatpush1.bf16.msra.mxu0 %v3001_v41  ;;  %v3067_v41 = vld [vmem:[#allocation2 + $0x3c0] ss:$8 sps:$4 sm:$0xff]  }
  0xd1   :  { %984 = vmatprep.subr.bf16.mxu0 %v3006_v42  ;;  %v3072_v42 = vld [vmem:[#allocation2 + $0x3d4] ss:$8 sps:$4 sm:$0xff]  }
  0xd4   :  { %985 = vmatpush1.bf16.msra.mxu0 %v3004_v45  ;;  %v3073_v45 = vld [vmem:[#allocation2 + $0x3e0] ss:$8 sps:$4 sm:$0xff]  }
  0xd5   :  { %986 = vmatprep.subr.bf16.mxu0 %v3009_v46  ;;  %v3078_v46 = vld [vmem:[#allocation2 + $0x3f4] ss:$8 sps:$4 sm:$0xff]  }
  0xd8   :  { %987 = vmatpush1.bf16.msra.mxu0 %v3007_v49  ;;  %v94_v49 = vld [vmem:[%s3650_s0 + $0x70] sm:$0xff] }
  0xd9   :  { %988 = vmatprep.subr.bf16.mxu0 %v3012_v50  ;;  %v102_v50 = vpack.c.bf16 %v94_v49, %v86_v48 }
  0xdc   :  { %989 = vmatpush1.bf16.msra.mxu0 %v3010_v53  ;;  %v3123_v53 = vld [vmem:[%s3654_s4 + $0xe0] ss:$8 sps:$4 sm:$0xff]  }
  0xdd   :  { %990 = vmatprep.subr.bf16.mxu0 %v3015_v54  ;;  %1295 = vmatpush1.bf16.msra.mxu1 %v3123_v53  ;;  %v3124_v54 = vld [vmem:[%s3654_s4 + $0xf4] ss:$8 sps:$4 sm:$0xff]  }
  0xde   :  { %1296 = vmatprep.subr.bf16.mxu1 %v3124_v54  ;;  %v1522_v54 = vld [vmem:[#allocation6 + $0x158] sm:$0xff] }
  0xe0   :  { %991 = vmatpush1.bf16.msra.mxu0 %v3013_v57  ;;  %v234_v57 = vlaneseq }
  0xe1   :  { %992 = vmatprep.subr.bf16.mxu0 %v3018_v58  ;;  %1297 = vmatpush1.bf16.msra.mxu1 %v3126_v55  ;;  %v1526_v55 = vld [vmem:[#allocation6 + $0x178] sm:$0xff] }
  0xe2   :  { %1430 = vmatprep.subr.bf16.mxu1 %v3129_v56  ;;  %v3517_v58 = vshrl.u32 %v234_v57, 7  ;;  %v2781_v56 = vcombine.low %v1522_v54, %v1526_v55  ;;  %v2782_v57 = vcombine.high %v1522_v54, %v1526_v55  ;;  %v1487_v54 = vld [vmem:[#allocation6 + $0x40] sm:$0xff] }
  0xe3   :  { %v1491_v55 = vld [vmem:[#allocation6 + $0x60] sm:$0xff] }
  0xe4   :  { %993 = vmatpush1.bf16.msra.mxu0 %v3016_v61  ;;  %v3520_v59 = vsub.s32 0, %v3517_v58  ;;  %v3526_v61 = vsub.s32 1, %v3517_v58 }
  0xe5   :  { %994 = vmatprep.subr.bf16.mxu0 %v3021_v62 }
  0xe6   :  { %v237_v62 = vrot.slane %v232_v60, %v3520_v59  ;;  %v241_v63 = vrot.slane %v232_v60, %v3526_v61  ;;  %v1530_v60 = vld [vmem:[#allocation6 + $0x198] sm:$0xff] }
  0xe8   :  { %995 = vmatpush1.bf16.msra.mxu0 %v3019_v1 }
  0xe9   :  { %996 = vmatprep.subr.bf16.mxu0 %v3024_v2 }
  0xec   :  { %997 = vmatpush1.bf16.msra.mxu0 %v3022_v5 }
  0xed   :  { %998 = vmatprep.subr.bf16.mxu0 %v3027_v6 }
  0xf0   :  { %999 = vmatpush1.bf16.msra.mxu0 %v3025_v7 }
  0xf1   :  { %1000 = vmatprep.subr.bf16.mxu0 %v3030_v8 }
  0xf4   :  { %1001 = vmatpush1.bf16.msra.mxu0 %v3028_v9 }
  0xf5   :  { %1013 = vmatprep.subr.bf16.mxu0 %v3033_v12 }
  0xf7   :  { %1003 = vmatmul.mubr.bf16.vlgmr.msra.gmra.mrb[0].mxu0 %v100_v15  ;;  %v3132_v15 = vld [vmem:[#allocation4 + $0x14] ss:$8 sps:$4 sm:$0xff]  }
  0xf8   :  { %1014 = vmatpush1.bf16.msra.mxu0 %v3031_v16  ;;  %1045 = vmatprep.mubr.bf16.mxu0 %v103_v17  ;;  %v3130_v16 = vld [vmem:[#allocation4 + $0x10] ss:$8 sps:$4 sm:$0xff]   ;;  %v3135_v17 = vld [vmem:[#allocation4 + $0x24] ss:$8 sps:$4 sm:$0xff]  }
  0xf9   :  { %1015 = vmatprep.subr.bf16.mxu0 %v3036_v18  ;;  %v3133_v18 = vld [vmem:[#allocation4 + $0x20] ss:$8 sps:$4 sm:$0xff]  }
  0xfc   :  { %1016 = vmatpush1.bf16.msra.mxu0 %v3034_v19  ;;  %v3138_v19 = vld [vmem:[#allocation4 + $0x34] ss:$8 sps:$4 sm:$0xff]  }
  0xfd   :  { %1017 = vmatprep.subr.bf16.mxu0 %v3039_v20  ;;  %v3136_v20 = vld [vmem:[#allocation4 + $0x30] ss:$8 sps:$4 sm:$0xff]  }
 0x100   :  { %1018 = vmatpush1.bf16.msra.mxu0 %v3037_v21  ;;  %v3141_v21 = vld [vmem:[#allocation4 + $0x44] ss:$8 sps:$4 sm:$0xff]  }
 0x101   :  { %1019 = vmatprep.subr.bf16.mxu0 %v3042_v22  ;;  %v3139_v22 = vld [vmem:[#allocation4 + $0x40] ss:$8 sps:$4 sm:$0xff]  }
 0x104   :  { %1020 = vmatpush1.bf16.msra.mxu0 %v3040_v23  ;;  %v3144_v23 = vld [vmem:[#allocation4 + $0x54] ss:$8 sps:$4 sm:$0xff]  }
 0x105   :  { %1021 = vmatprep.subr.bf16.mxu0 %v3045_v24  ;;  %v3142_v24 = vld [vmem:[#allocation4 + $0x50] ss:$8 sps:$4 sm:$0xff]  }
 0x108   :  { %1022 = vmatpush1.bf16.msra.mxu0 %v3043_v25  ;;  %v3147_v25 = vld [vmem:[#allocation4 + $0x64] ss:$8 sps:$4 sm:$0xff]  }
 0x109   :  { %1023 = vmatprep.subr.bf16.mxu0 %v3048_v26  ;;  %v3264_v26 = vmov 0  }
 0x10c   :  { %1024 = vmatpush1.bf16.msra.mxu0 %v3046_v27  ;;  %v3145_v27 = vld [vmem:[#allocation4 + $0x60] ss:$8 sps:$4 sm:$0xff]  }
 0x10d   :  { %1025 = vmatprep.subr.bf16.mxu0 %v3051_v28  ;;  %v3150_v28 = vld [vmem:[#allocation4 + $0x74] ss:$8 sps:$4 sm:$0xff]  }
 0x110   :  { %1026 = vmatpush1.bf16.msra.mxu0 %v3049_v29  ;;  %v3148_v29 = vld [vmem:[#allocation4 + $0x70] ss:$8 sps:$4 sm:$0xff]  }
 0x111   :  { %1027 = vmatprep.subr.bf16.mxu0 %v3054_v30  ;;  %v3530_v30 = vld [vmem:[#allocation6] sm:$0xff] }
 0x114   :  { %1028 = vmatpush1.bf16.msra.mxu0 %v3052_v31  ;;  %v3532_v31 = vld [vmem:[#allocation6 + $0x20] sm:$0xff] }
 0x115   :  { %1029 = vmatprep.subr.bf16.mxu0 %v3057_v32  ;;  %v2735_v32 = vcombine.low %v3530_v30, %v3532_v31 }
 0x118   :  { %1030 = vmatpush1.bf16.msra.mxu0 %v3055_v33  ;;  %v2736_v33 = vcombine.high %v3530_v30, %v3532_v31 }
 0x119   :  { %1031 = vmatprep.subr.bf16.mxu0 %v3060_v34  ;;  %v1482_v34 = vld [vmem:[#allocation6 + $0x18] sm:$0xff] }
 0x11c   :  { %1032 = vmatpush1.bf16.msra.mxu0 %v3058_v35  ;;  %v1486_v35 = vld [vmem:[#allocation6 + $0x38] sm:$0xff] }
 0x11d   :  { %1033 = vmatprep.subr.bf16.mxu0 %v3063_v36  ;;  %v2741_v36 = vcombine.low %v1482_v34, %v1486_v35 }
 0x120   :  { %1034 = vmatpush1.bf16.msra.mxu0 %v3061_v37  ;;  %v2742_v37 = vcombine.high %v1482_v34, %v1486_v35 }
 0x121   :  { %1035 = vmatprep.subr.bf16.mxu0 %v3066_v38  ;;  %v1490_v38 = vld [vmem:[#allocation6 + $0x58] sm:$0xff] }
 0x124   :  { %1036 = vmatpush1.bf16.msra.mxu0 %v3064_v39  ;;  %v1494_v39 = vld [vmem:[#allocation6 + $0x78] sm:$0xff] }
 0x125   :  { %1037 = vmatprep.subr.bf16.mxu0 %v3069_v40  ;;  %v2749_v40 = vcombine.low %v1490_v38, %v1494_v39 }
 0x128   :  { %1038 = vmatpush1.bf16.msra.mxu0 %v3067_v41  ;;  %v2750_v41 = vcombine.high %v1490_v38, %v1494_v39 }
 0x129   :  { %1039 = vmatprep.subr.bf16.mxu0 %v3072_v42  ;;  %v1498_v42 = vld [vmem:[#allocation6 + $0x98] sm:$0xff] }
 0x12c   :  { %1040 = vmatpush1.bf16.msra.mxu0 %v3070_v43  ;;  %v1502_v43 = vld [vmem:[#allocation6 + $0xb8] sm:$0xff] }
 0x12d   :  { %1041 = vmatprep.subr.bf16.mxu0 %v3075_v44  ;;  %v2757_v44 = vcombine.low %v1498_v42, %v1502_v43 }
 0x130   :  { %1042 = vmatpush1.bf16.msra.mxu0 %v3073_v45  ;;  %v2758_v45 = vcombine.high %v1498_v42, %v1502_v43 }
 0x131   :  { %1043 = vmatprep.subr.bf16.mxu0 %v3078_v46  ;;  %v1506_v46 = vld [vmem:[#allocation6 + $0xd8] sm:$0xff] }
 0x134   :  { %1044 = vmatpush1.bf16.msra.mxu0 %v3076_v47  ;;  %v1510_v47 = vld [vmem:[#allocation6 + $0xf8] sm:$0xff] }
 0x135   :  { %2418 = vmatprep.subr.bf16.mxu0 %v2742_v37  ;;  %v2765_v48 = vcombine.low %v1506_v46, %v1510_v47  ;;  %v2766_v49 = vcombine.high %v1506_v46, %v1510_v47  ;;  %v1315_v47 = vld [vmem:[%s3651_s1] sm:$0xff] }
 0x137   :  { %1046 = vmatmul.mubr.bf16.vlgmr.msra.gmra.mrb[0].mxu0 %v102_v50  ;;  %v1514_v50 = vld [vmem:[#allocation6 + $0x118] sm:$0xff] }
 0x138   :  { %2419 = vmatpush1.bf16.msra.mxu0 %v2741_v36  ;;  %v2773_v52 = vcombine.low %v1514_v50, %v1518_v51  ;;  %v2774_v53 = vcombine.high %v1514_v50, %v1518_v51 }
 0x139   :  { %2420 = vmatprep.subr.bf16.mxu0 %v2750_v41 }
 0x13c   :  { %2421 = vmatpush1.bf16.msra.mxu0 %v2749_v40 }
 0x13d   :  { %2422 = vmatprep.subr.bf16.mxu0 %v2758_v45 }
 0x140   :  { %2423 = vmatpush1.bf16.msra.mxu0 %v2757_v44 }
 0x141   :  { %2424 = vmatprep.subr.bf16.mxu0 %v2766_v49  ;;  %v1316_v49 = vld [vmem:[%s3651_s1 + $0x8] sm:$0xff] }
 0x144   :  { %2425 = vmatpush1.bf16.msra.mxu0 %v2765_v48 }
 0x145   :  { %2426 = vmatprep.subr.bf16.mxu0 %v2774_v53 }
 0x148   :  { %2427 = vmatpush1.bf16.msra.mxu0 %v2773_v52 }
 0x149   :  { %2428 = vmatprep.subr.bf16.mxu0 %v2782_v57 }
 0x14c   :  { %2429 = vmatpush1.bf16.msra.mxu0 %v2781_v56 }
 0x20a   :  { %v1047_v0 = vpop.f32.mrb[0].mxu0 }
 0x20b   :  { %v2863_v1 = vadd.f32 %v1047_v0, %v237_v62  ;;  %v1049_v2 = vpop.f32.mrb[1].mxu0 }
 0x20c   :  { %v2864_v3 = vadd.f32 %v1049_v2, %v241_v63  ;;  %v1051_v4 = vpop.f32.mrb[2].mxu0  ;;  %v1542_v2 = vld [vmem:[#allocation6 + $0x1f8] sm:$0xff] }
 0x20d   :  { %v2865_v5 = vadd.f32 %v1051_v4, %v237_v62  ;;  %v1053_v6 = vpop.f32.mrb[3].mxu0  ;;  %v1056_v8 = vmax.f32 %v2863_v1, 0.0  ;;  %v1534_v62 = vld [vmem:[#allocation6 + $0x1b8] sm:$0xff] }
 0x20e   :  { %v2866_v7 = vadd.f32 %v1053_v6, %v241_v63  ;;  %v1057_v10 = vmax.f32 %v2864_v3, 0.0  ;;  %v2789_v63 = vcombine.low %v1530_v60, %v1534_v62  ;;  %v2790_v0 = vcombine.high %v1530_v60, %v1534_v62  ;;  %v1538_v1 = vld [vmem:[#allocation6 + $0x1d8] sm:$0xff]  ;;  %v1495_v62 = vld [vmem:[#allocation6 + $0x80] sm:$0xff] }
 0x20f   :  { %v1058_v9 = vmax.f32 %v2865_v5, 0.0  ;;  %v2797_v3 = vcombine.low %v1538_v1, %v1542_v2  ;;  %v2798_v4 = vcombine.high %v1538_v1, %v1542_v2  ;;  %v1546_v5 = vld [vmem:[#allocation6 + $0x218] sm:$0xff]  ;;  %v2744_v60 = vcombine.high %v1487_v54, %v1491_v55  ;;  %v1503_v2 = vld [vmem:[#allocation6 + $0xc0] sm:$0xff] }
 0x210   :  { %v1059_v11 = vmax.f32 %v2866_v7, 0.0  ;;  %2430 = vmatprep.subr.bf16.mxu0 %v2790_v0  ;;  %v1550_v6 = vld [vmem:[#allocation6 + $0x238] sm:$0xff]  ;;  %v2743_v0 = vcombine.low %v1487_v54, %v1491_v55  ;;  %v1599_v55 = vld [vmem:[#allocation6 + $0x3c0] sm:$0xff] }
 0x211   :  { %v1060_v12 = vpack.c.bf16 %v1058_v9, %v1056_v8  ;;  %2431 = vmatpush1.bf16.msra.mxu0 %v2789_v63  ;;  %v2805_v7 = vcombine.low %v1546_v5, %v1550_v6  ;;  %v2806_v8 = vcombine.high %v1546_v5, %v1550_v6  ;;  %v1554_v9 = vld [vmem:[#allocation6 + $0x258] sm:$0xff]  ;;  %v1499_v63 = vld [vmem:[#allocation6 + $0xa0] sm:$0xff] }
 0x212   :  { %v1061_v13 = vpack.c.bf16 %v1059_v11, %v1057_v10  ;;  %2432 = vmatprep.subr.bf16.mxu0 %v2798_v4  ;;  %v1558_v10 = vld [vmem:[#allocation6 + $0x278] sm:$0xff]  ;;  %v2752_v1 = vcombine.high %v1495_v62, %v1499_v63  ;;  %v2751_v4 = vcombine.low %v1495_v62, %v1499_v63  ;;  %v1511_v6 = vld [vmem:[#allocation6 + $0x100] sm:$0xff] }
 0x213   :  { %v2813_v11 = vcombine.low %v1554_v9, %v1558_v10  ;;  %v1606_v62 = vld [vmem:[#allocation6 + $0x3f8] sm:$0xff] }
 0x214   :  { %1298 = vmatprep.mubr.bf16.mxu1 %v1061_v13  ;;  %v1562_v13 = vld [vmem:[#allocation6 + $0x298] sm:$0xff] }
 0x215   :  { %1299 = vmatmul.mubr.bf16.vlgmr.msra.gmra.mrb[0].mxu1 %v1060_v12  ;;  %2433 = vmatpush1.bf16.msra.mxu0 %v2797_v3  ;;  %v2814_v12 = vcombine.high %v1554_v9, %v1558_v10  ;;  %v1507_v3 = vld [vmem:[#allocation6 + $0xe0] sm:$0xff] }
 0x216   :  { %1431 = vmatpush1.bf16.msra.mxu1 %v3127_v14  ;;  %1462 = vmatprep.mubr.bf16.mxu1 %v3264_v26  ;;  %v1566_v14 = vld [vmem:[#allocation6 + $0x2b8] sm:$0xff]  ;;  %v2760_v5 = vcombine.high %v1503_v2, %v1507_v3  ;;  %v1519_v10 = vld [vmem:[#allocation6 + $0x140] sm:$0xff] }
 0x217   :  { %1432 = vmatprep.subr.bf16.mxu1 %v3132_v15  ;;  %2434 = vmatprep.subr.bf16.mxu0 %v2806_v8  ;;  %v2821_v15 = vcombine.low %v1562_v13, %v1566_v14  ;;  %v1590_v26 = vld [vmem:[#allocation6 + $0x378] sm:$0xff]  ;;  %v2759_v8 = vcombine.low %v1503_v2, %v1507_v3  ;;  %v1480_v2 = vld [vmem:[#allocation6 + $0x8] sm:$0xff] }
 0x218   :  { %v1484_v3 = vld [vmem:[#allocation6 + $0x28] sm:$0xff] }
 0x219   :  { %2435 = vmatpush1.bf16.msra.mxu0 %v2805_v7  ;;  %v1515_v7 = vld [vmem:[#allocation6 + $0x120] sm:$0xff] }
 0x21a   :  { %1433 = vmatpush1.bf16.msra.mxu1 %v3130_v16  ;;  %2436 = vmatprep.subr.bf16.mxu0 %v2814_v12  ;;  %v2822_v16 = vcombine.high %v1562_v13, %v1566_v14  ;;  %v2768_v9 = vcombine.high %v1511_v6, %v1515_v7  ;;  %v2767_v30 = vcombine.low %v1511_v6, %v1515_v7  ;;  %v1531_v12 = vld [vmem:[#allocation6 + $0x1a0] sm:$0xff] }
 0x21b   :  { %1434 = vmatprep.subr.bf16.mxu1 %v3135_v17  ;;  %v1570_v17 = vld [vmem:[#allocation6 + $0x2d8] sm:$0xff]  ;;  %v1338_v6 = vld [vmem:[%s3657_s7] sm:$0x3] }
 0x21c   :  { %v1343_v7 = vrot.slane %v1338_v6, %v3520_v59 }
 0x21d   :  { %2437 = vmatpush1.bf16.msra.mxu0 %v2813_v11  ;;  %v1523_v11 = vld [vmem:[#allocation6 + $0x160] sm:$0xff] }
 0x21e   :  { %1435 = vmatpush1.bf16.msra.mxu1 %v3133_v18  ;;  %2438 = vmatprep.subr.bf16.mxu0 %v2822_v16  ;;  %v1574_v18 = vld [vmem:[#allocation6 + $0x2f8] sm:$0xff]  ;;  %v2776_v31 = vcombine.high %v1519_v10, %v1523_v11  ;;  %v2775_v13 = vcombine.low %v1519_v10, %v1523_v11  ;;  %v1539_v16 = vld [vmem:[#allocation6 + $0x1e0] sm:$0xff] }
 0x21f   :  { %1436 = vmatprep.subr.bf16.mxu1 %v3138_v19  ;;  %v2829_v19 = vcombine.low %v1570_v17, %v1574_v18 }
 0x221   :  { %2439 = vmatpush1.bf16.msra.mxu0 %v2821_v15  ;;  %v1535_v15 = vld [vmem:[#allocation6 + $0x1c0] sm:$0xff] }
 0x222   :  { %1437 = vmatpush1.bf16.msra.mxu1 %v3136_v20  ;;  %v2830_v20 = vcombine.high %v1570_v17, %v1574_v18  ;;  %v2792_v18 = vcombine.high %v1535_v15, %v1539_v16 }
 0x223   :  { %1438 = vmatprep.subr.bf16.mxu1 %v3141_v21  ;;  %v1578_v21 = vld [vmem:[#allocation6 + $0x318] sm:$0xff] }
 0x224   :  { %2440 = vmatprep.subr.bf16.mxu0 %v2830_v20  ;;  %v1547_v20 = vld [vmem:[#allocation6 + $0x220] sm:$0xff] }
 0x225   :  { %2441 = vmatpush1.bf16.msra.mxu0 %v2829_v19  ;;  %v1543_v19 = vld [vmem:[#allocation6 + $0x200] sm:$0xff] }
 0x226   :  { %1439 = vmatpush1.bf16.msra.mxu1 %v3139_v22  ;;  %v1582_v22 = vld [vmem:[#allocation6 + $0x338] sm:$0xff] }
 0x227   :  { %1440 = vmatprep.subr.bf16.mxu1 %v3144_v23  ;;  %v2837_v23 = vcombine.low %v1578_v21, %v1582_v22 }
 0x22a   :  { %1441 = vmatpush1.bf16.msra.mxu1 %v3142_v24  ;;  %v2838_v24 = vcombine.high %v1578_v21, %v1582_v22  ;;  %v2791_v21 = vcombine.low %v1535_v15, %v1539_v16  ;;  %v2800_v22 = vcombine.high %v1543_v19, %v1547_v20 }
 0x22b   :  { %1442 = vmatprep.subr.bf16.mxu1 %v3147_v25  ;;  %v1586_v25 = vld [vmem:[#allocation6 + $0x358] sm:$0xff] }
 0x22c   :  { %2442 = vmatprep.subr.bf16.mxu0 %v2838_v24  ;;  %v1555_v24 = vld [vmem:[#allocation6 + $0x260] sm:$0xff] }
 0x22d   :  { %2443 = vmatpush1.bf16.msra.mxu0 %v2837_v23  ;;  %v1551_v23 = vld [vmem:[#allocation6 + $0x240] sm:$0xff] }
 0x22e   :  { %1443 = vmatpush1.bf16.msra.mxu1 %v3145_v27  ;;  %v2845_v27 = vcombine.low %v1586_v25, %v1590_v26 }
 0x22f   :  { %1444 = vmatprep.subr.bf16.mxu1 %v3150_v28  ;;  %v2846_v28 = vcombine.high %v1586_v25, %v1590_v26  ;;  %v2799_v25 = vcombine.low %v1543_v19, %v1547_v20  ;;  %v2808_v26 = vcombine.high %v1551_v23, %v1555_v24  ;;  %v1492_v19 = vld [vmem:[#allocation6 + $0x68] sm:$0xff] }
 0x231   :  { %2444 = vmatprep.subr.bf16.mxu0 %v2846_v28  ;;  %v1563_v28 = vld [vmem:[#allocation6 + $0x2a0] sm:$0xff] }
 0x232   :  { %1445 = vmatpush1.bf16.msra.mxu1 %v3148_v29  ;;  %2445 = vmatpush1.bf16.msra.mxu0 %v2845_v27  ;;  %v1094_v29 = vld [vmem:[%s3655_s5] sm:$0x3] }
 0x233   :  { %2289 = vmatprep.subr.bf16.mxu1 %v2736_v33  ;;  %v1099_v33 = vrot.slane %v1094_v29, %v3520_v59  ;;  %v1103_v34 = vrot.slane %v1094_v29, %v3526_v61  ;;  %v1559_v27 = vld [vmem:[#allocation6 + $0x280] sm:$0xff]  ;;  %v2807_v29 = vcombine.low %v1551_v23, %v1555_v24  ;;  %v1496_v23 = vld [vmem:[#allocation6 + $0x88] sm:$0xff] }
 0x234   :  { %v1500_v24 = vld [vmem:[#allocation6 + $0xa8] sm:$0xff] }
 0x2e8   :  { %v1300_v35 = vpop.f32.mrb[0].mxu1 }
 0x2e9   :  { %v1301_v36 = vadd.f32 %v1300_v35, %v1099_v33  ;;  %v1302_v37 = vpop.f32.mrb[1].mxu1  ;;  %v1571_v35 = vld [vmem:[#allocation6 + $0x2e0] sm:$0xff] }
 0x2ea   :  { %v1303_v38 = vadd.f32 %v1302_v37, %v1103_v34  ;;  %v1304_v39 = vpop.f32.mrb[2].mxu1 }
 0x2eb   :  { %2541 = vst [vmem:[%s3661_s11] sm:$0xff] %v1301_v36  ;;  %v1305_v40 = vadd.f32 %v1304_v39, %v1099_v33  ;;  %v1306_v41 = vpop.f32.mrb[3].mxu1  ;;  %v2816_v33 = vcombine.high %v1559_v27, %v1563_v28  ;;  %v1579_v39 = vld [vmem:[#allocation6 + $0x320] sm:$0xff] }
 0x2ec   :  { %v1309_v42 = vmul.f32 0.5, %v1303_v38  ;;  %2543 = vst [vmem:[%s3662_s12] sm:$0xff] %v1303_v38  ;;  %v1307_v43 = vadd.f32 %v1306_v41, %v1103_v34  ;;  %v1567_v34 = vld [vmem:[#allocation6 + $0x2c0] sm:$0xff] }
 0x2ed   :  { %2542 = vst [vmem:[%s3661_s11 + $0x8] sm:$0xff] %v1305_v40  ;;  %v2824_v37 = vcombine.high %v1567_v34, %v1571_v35  ;;  %v1575_v38 = vld [vmem:[#allocation6 + $0x300] sm:$0xff] }
 0x2ee   :  { %v1311_v44 = vmul.f32 1.442695, %v1309_v42  ;;  %v1310_v45 = vmul.f32 0.5, %v1307_v43  ;;  %2544 = vst [vmem:[%s3662_s12 + $0x8] sm:$0xff] %v1307_v43  ;;  %v2832_v41 = vcombine.high %v1575_v38, %v1579_v39  ;;  %v1583_v42 = vld [vmem:[#allocation6 + $0x340] sm:$0xff] }
 0x2ef   :  { %v1587_v43 = vld [vmem:[#allocation6 + $0x360] sm:$0xff] }
 0x2f0   :  { %3151 = vpow2.f32 %v1311_v44  ;;  %v1313_v46 = vmul.f32 1.442695, %v1310_v45  ;;  %v2831_v44 = vcombine.low %v1575_v38, %v1579_v39  ;;  %v2840_v45 = vcombine.high %v1583_v42, %v1587_v43  ;;  %v1520_v38 = vld [vmem:[#allocation6 + $0x148] sm:$0xff] }
 0x2f1   :  { %v1524_v39 = vld [vmem:[#allocation6 + $0x168] sm:$0xff] }
 0x2f2   :  { %3153 = vpow2.f32 %v1313_v46  ;;  %v2839_v46 = vcombine.low %v1583_v42, %v1587_v43  ;;  %v1528_v42 = vld [vmem:[#allocation6 + $0x188] sm:$0xff] }
 0x2f3   :  { %v1532_v43 = vld [vmem:[#allocation6 + $0x1a8] sm:$0xff] }
 0x2fa   :  { %v3152_v48 = vpop.eup %3151 }
 0x2fb   :  { %v1317_v50 = vmul.f32 %v3152_v48, %v1315_v47  ;;  %v1591_v47 = vld [vmem:[#allocation6 + $0x380] sm:$0xff] }
 0x2fc   :  { %v3154_v51 = vpop.eup %3153  ;;  %v1595_v48 = vld [vmem:[#allocation6 + $0x3a0] sm:$0xff] }
 0x2fd   :  { %v1318_v52 = vmul.f32 %v3154_v51, %v1316_v49  ;;  %v1319_v53 = vadd.f32 %v1317_v50, %v1301_v36  ;;  %v2815_v36 = vcombine.low %v1559_v27, %v1563_v28  ;;  %v2848_v49 = vcombine.high %v1591_v47, %v1595_v48  ;;  %v1594_v50 = vld [vmem:[#allocation6 + $0x398] sm:$0xff]  ;;  %v1504_v27 = vld [vmem:[#allocation6 + $0xc8] sm:$0xff] }
 0x2fe   :  { %v1598_v51 = vld [vmem:[#allocation6 + $0x3b8] sm:$0xff]  ;;  %v1508_v28 = vld [vmem:[#allocation6 + $0xe8] sm:$0xff] }
 0x2ff   :  { %v1320_v56 = vadd.f32 %v1318_v52, %v1305_v40  ;;  %v2823_v40 = vcombine.low %v1567_v34, %v1571_v35  ;;  %v2847_v52 = vcombine.low %v1591_v47, %v1595_v48  ;;  %v2853_v54 = vcombine.low %v1594_v50, %v1598_v51  ;;  %v1512_v34 = vld [vmem:[#allocation6 + $0x108] sm:$0xff] }
 0x300   :  { %v1516_v35 = vld [vmem:[#allocation6 + $0x128] sm:$0xff]  ;;  %v2785_v48 = vcombine.low %v1528_v42, %v1532_v43 }
 0x301   :  { %v1321_v57 = vpack.c.bf16 %v1320_v56, %v1319_v53  ;;  %v2854_v53 = vcombine.high %v1594_v50, %v1598_v51  ;;  %v1603_v56 = vld [vmem:[#allocation6 + $0x3e0] sm:$0xff]  ;;  %v1540_v47 = vld [vmem:[#allocation6 + $0x1e8] sm:$0xff] }
 0x302   :  { %v2855_v63 = vcombine.low %v1599_v55, %v1603_v56  ;;  %v1544_v50 = vld [vmem:[#allocation6 + $0x208] sm:$0xff] }
 0x303   :  { %1463 = vmatmul.mubr.bf16.vlgmr.msra.gmra.mrb[4].mxu1 %v1321_v57  ;;  %2446 = vmatprep.subr.bf16.mxu0 %v2854_v53  ;;  %v2856_v57 = vcombine.high %v1599_v55, %v1603_v56  ;;  %v1548_v51 = vld [vmem:[#allocation6 + $0x228] sm:$0xff] }
 0x304   :  { %2290 = vmatpush1.bf16.msra.mxu1 %v2735_v32  ;;  %v1527_v32 = vld [vmem:[#allocation6 + $0x180] sm:$0xff]  ;;  %2447 = vmatpush1.bf16.msra.mxu0 %v2853_v54  ;;  %v2802_v53 = vcombine.high %v1544_v50, %v1548_v51  ;;  %v1552_v54 = vld [vmem:[#allocation6 + $0x248] sm:$0xff]  ;;  %v2801_v56 = vcombine.low %v1544_v50, %v1548_v51  ;;  %v1537_v50 = vld [vmem:[#allocation6 + $0x1d0] sm:$0xff] }
 0x305   :  { %2291 = vmatprep.subr.bf16.mxu1 %v2744_v60  ;;  %v2784_v14 = vcombine.high %v1527_v32, %v1531_v12  ;;  %v2783_v17 = vcombine.low %v1527_v32, %v1531_v12  ;;  %v1602_v60 = vld [vmem:[#allocation6 + $0x3d8] sm:$0xff]  ;;  %v1556_v55 = vld [vmem:[#allocation6 + $0x268] sm:$0xff]  ;;  %v1541_v51 = vld [vmem:[#allocation6 + $0x1f0] sm:$0xff] }
 0x308   :  { %2292 = vmatpush1.bf16.msra.mxu1 %v2743_v0  ;;  %v2862_v0 = vcombine.high %v1602_v60, %v1606_v62 }
 0x309   :  { %2293 = vmatprep.subr.bf16.mxu1 %v2752_v1  ;;  %v2861_v1 = vcombine.low %v1602_v60, %v1606_v62  ;;  %v1560_v60 = vld [vmem:[#allocation6 + $0x288] sm:$0xff] }
 0x30a   :  { %2448 = vmatprep.subr.bf16.mxu0 %v2862_v0  ;;  %v1564_v62 = vld [vmem:[#allocation6 + $0x2a8] sm:$0xff] }
 0x30b   :  { %2449 = vmatpush1.bf16.msra.mxu0 %v2861_v1  ;;  %v2818_v0 = vcombine.high %v1560_v60, %v1564_v62  ;;  %v1568_v1 = vld [vmem:[#allocation6 + $0x2c8] sm:$0xff] }
 0x30c   :  { %2294 = vmatpush1.bf16.msra.mxu1 %v2751_v4  ;;  %v2738_v4 = vcombine.high %v1480_v2, %v1484_v3 }
 0x30d   :  { %2295 = vmatprep.subr.bf16.mxu1 %v2760_v5  ;;  %v2737_v5 = vcombine.low %v1480_v2, %v1484_v3  ;;  %v1572_v2 = vld [vmem:[#allocation6 + $0x2e8] sm:$0xff]  ;;  %v2817_v3 = vcombine.low %v1560_v60, %v1564_v62  ;;  %v1553_v60 = vld [vmem:[#allocation6 + $0x250] sm:$0xff] }
 0x30e   :  { %v1557_v62 = vld [vmem:[#allocation6 + $0x270] sm:$0xff] }
 0x310   :  { %2296 = vmatpush1.bf16.msra.mxu1 %v2759_v8  ;;  %v1347_v8 = vrot.slane %v1338_v6, %v3526_v61  ;;  %v1580_v6 = vld [vmem:[#allocation6 + $0x328] sm:$0xff] }
 0x311   :  { %2297 = vmatprep.subr.bf16.mxu1 %v2768_v9 }
 0x314   :  { %2298 = vmatpush1.bf16.msra.mxu1 %v2767_v30 }
 0x315   :  { %2299 = vmatprep.subr.bf16.mxu1 %v2776_v31 }
 0x318   :  { %2300 = vmatpush1.bf16.msra.mxu1 %v2775_v13 }
 0x319   :  { %2301 = vmatprep.subr.bf16.mxu1 %v2784_v14 }
 0x31c   :  { %2302 = vmatpush1.bf16.msra.mxu1 %v2783_v17 }
 0x31d   :  { %2303 = vmatprep.subr.bf16.mxu1 %v2792_v18  ;;  %v1488_v18 = vld [vmem:[#allocation6 + $0x48] sm:$0xff] }
 0x320   :  { %2304 = vmatpush1.bf16.msra.mxu1 %v2791_v21 }
 0x321   :  { %2305 = vmatprep.subr.bf16.mxu1 %v2800_v22  ;;  %v2746_v22 = vcombine.high %v1488_v18, %v1492_v19 }
 0x324   :  { %2306 = vmatpush1.bf16.msra.mxu1 %v2799_v25  ;;  %v2745_v25 = vcombine.low %v1488_v18, %v1492_v19  ;;  %v1481_v18 = vld [vmem:[#allocation6 + $0x10] sm:$0xff] }
 0x325   :  { %2307 = vmatprep.subr.bf16.mxu1 %v2808_v26  ;;  %v2754_v26 = vcombine.high %v1496_v23, %v1500_v24  ;;  %v1485_v19 = vld [vmem:[#allocation6 + $0x30] sm:$0xff] }
 0x328   :  { %2308 = vmatpush1.bf16.msra.mxu1 %v2807_v29  ;;  %v2753_v29 = vcombine.low %v1496_v23, %v1500_v24  ;;  %v2740_v23 = vcombine.high %v1481_v18, %v1485_v19  ;;  %v1489_v24 = vld [vmem:[#allocation6 + $0x50] sm:$0xff] }
 0x329   :  { %2309 = vmatprep.subr.bf16.mxu1 %v2816_v33  ;;  %v2762_v33 = vcombine.high %v1504_v27, %v1508_v28 }
 0x32c   :  { %2310 = vmatpush1.bf16.msra.mxu1 %v2815_v36  ;;  %v2761_v36 = vcombine.low %v1504_v27, %v1508_v28  ;;  %v1497_v28 = vld [vmem:[#allocation6 + $0x90] sm:$0xff] }
 0x32d   :  { %2311 = vmatprep.subr.bf16.mxu1 %v2824_v37  ;;  %v2770_v37 = vcombine.high %v1512_v34, %v1516_v35 }
 0x330   :  { %2312 = vmatpush1.bf16.msra.mxu1 %v2823_v40  ;;  %v2769_v40 = vcombine.low %v1512_v34, %v1516_v35  ;;  %v1505_v35 = vld [vmem:[#allocation6 + $0xd0] sm:$0xff] }
 0x331   :  { %2313 = vmatprep.subr.bf16.mxu1 %v2832_v41  ;;  %v2778_v41 = vcombine.high %v1520_v38, %v1524_v39 }
 0x334   :  { %2314 = vmatpush1.bf16.msra.mxu1 %v2831_v44  ;;  %v2777_v44 = vcombine.low %v1520_v38, %v1524_v39  ;;  %v1513_v39 = vld [vmem:[#allocation6 + $0x110] sm:$0xff] }
 0x335   :  { %2315 = vmatprep.subr.bf16.mxu1 %v2840_v45  ;;  %v2786_v45 = vcombine.high %v1528_v42, %v1532_v43  ;;  %v1521_v43 = vld [vmem:[#allocation6 + $0x150] sm:$0xff] }
 0x338   :  { %2316 = vmatpush1.bf16.msra.mxu1 %v2839_v46  ;;  %v1536_v46 = vld [vmem:[#allocation6 + $0x1c8] sm:$0xff] }
 0x339   :  { %2317 = vmatprep.subr.bf16.mxu1 %v2848_v49  ;;  %v2794_v49 = vcombine.high %v1536_v46, %v1540_v47 }
 0x33c   :  { %2318 = vmatpush1.bf16.msra.mxu1 %v2847_v52  ;;  %v2793_v52 = vcombine.low %v1536_v46, %v1540_v47  ;;  %v1529_v46 = vld [vmem:[#allocation6 + $0x190] sm:$0xff] }
 0x33d   :  { %2319 = vmatprep.subr.bf16.mxu1 %v2856_v57  ;;  %v2810_v57 = vcombine.high %v1552_v54, %v1556_v55  ;;  %v1533_v47 = vld [vmem:[#allocation6 + $0x1b0] sm:$0xff] }
 0x340   :  { %2320 = vmatpush1.bf16.msra.mxu1 %v2855_v63  ;;  %v2809_v63 = vcombine.low %v1552_v54, %v1556_v55  ;;  %v1545_v54 = vld [vmem:[#allocation6 + $0x210] sm:$0xff] }
 0x341   :  { %2332 = vmatprep.subr.bf16.mxu1 %v2738_v4  ;;  %v2826_v4 = vcombine.high %v1568_v1, %v1572_v2  ;;  %v1549_v55 = vld [vmem:[#allocation6 + $0x230] sm:$0xff] }
 0x3d6   :  { %v1464_v9 = vpop.f32.mrb[4].mxu1 }
 0x3d7   :  { %v1465_v10 = vadd.f32 %v1464_v9, %v1343_v7  ;;  %v1466_v11 = vpop.f32.mrb[5].mxu1  ;;  %v1584_v9 = vld [vmem:[#allocation6 + $0x348] sm:$0xff] }
 0x3d8   :  { %v1467_v30 = vadd.f32 %v1466_v11, %v1347_v8  ;;  %v1468_v31 = vpop.f32.mrb[6].mxu1 }
 0x3d9   :  { %v1469_v32 = vadd.f32 %v1468_v31, %v1343_v7  ;;  %v1470_v12 = vpop.f32.mrb[7].mxu1  ;;  %v1473_v14 = vmax.f32 %v1465_v10, 0.0  ;;  %v2825_v7 = vcombine.low %v1568_v1, %v1572_v2  ;;  %v1588_v10 = vld [vmem:[#allocation6 + $0x368] sm:$0xff]  ;;  %v1561_v1 = vld [vmem:[#allocation6 + $0x290] sm:$0xff] }
 0x3da   :  { %v1471_v13 = vadd.f32 %v1470_v12, %v1347_v8  ;;  %v1474_v16 = vmax.f32 %v1467_v30, 0.0  ;;  %v2842_v30 = vcombine.high %v1584_v9, %v1588_v10  ;;  %v1592_v31 = vld [vmem:[#allocation6 + $0x388] sm:$0xff]  ;;  %v2841_v12 = vcombine.low %v1584_v9, %v1588_v10  ;;  %v1565_v2 = vld [vmem:[#allocation6 + $0x2b0] sm:$0xff] }
 0x3db   :  { %v1475_v15 = vmax.f32 %v1469_v32, 0.0  ;;  %v1596_v32 = vld [vmem:[#allocation6 + $0x3a8] sm:$0xff]  ;;  %v1577_v9 = vld [vmem:[#allocation6 + $0x310] sm:$0xff] }
 0x3dc   :  { %v1476_v17 = vmax.f32 %v1471_v13, 0.0  ;;  %v2850_v13 = vcombine.high %v1592_v31, %v1596_v32  ;;  %v1581_v10 = vld [vmem:[#allocation6 + $0x330] sm:$0xff] }
 0x3dd   :  { %v3569_v20 = vpack.c.bf16 %v1475_v15, %v1473_v14  ;;  %v1600_v14 = vld [vmem:[#allocation6 + $0x3c8] sm:$0xff] }
 0x3de   :  { %v3571_v21 = vpack.c.bf16 %v1476_v17, %v1474_v16  ;;  %v1604_v15 = vld [vmem:[#allocation6 + $0x3e8] sm:$0xff]  ;;  %v2849_v16 = vcombine.low %v1592_v31, %v1596_v32  ;;  %v1585_v31 = vld [vmem:[#allocation6 + $0x350] sm:$0xff] }
 0x3df   :  { %v2858_v17 = vcombine.high %v1600_v14, %v1604_v15  ;;  %v1589_v32 = vld [vmem:[#allocation6 + $0x370] sm:$0xff] }
 0x3e0   :  { %2321 = vmatprep.mubr.bf16.mxu1 %v3571_v21  ;;  %2450 = vmatprep.mubr.bf16.mxu0 %v3571_v21 }
 0x3e1   :  { %2322 = vmatmul.mubr.bf16.vlgmr.msra.gmra.mrb[8].mxu1 %v3569_v20  ;;  %2451 = vmatmul.mubr.bf16.vlgmr.msra.gmra.mrb[4].mxu0 %v3569_v20 }
 0x3e2   :  { %2333 = vmatpush1.bf16.msra.mxu1 %v2737_v5  ;;  %2364 = vmatprep.mubr.bf16.mxu1 %v3571_v21  ;;  %v1576_v5 = vld [vmem:[#allocation6 + $0x308] sm:$0xff] }
 0x3e3   :  { %2334 = vmatprep.subr.bf16.mxu1 %v2746_v22  ;;  %v2834_v8 = vcombine.high %v1576_v5, %v1580_v6  ;;  %v2833_v11 = vcombine.low %v1576_v5, %v1580_v6  ;;  %v2857_v22 = vcombine.low %v1600_v14, %v1604_v15  ;;  %v1569_v5 = vld [vmem:[#allocation6 + $0x2d0] sm:$0xff] }
 0x3e4   :  { %v1573_v6 = vld [vmem:[#allocation6 + $0x2f0] sm:$0xff] }
 0x3e5   :  { %v1593_v14 = vld [vmem:[#allocation6 + $0x390] sm:$0xff] }
 0x3e6   :  { %2335 = vmatpush1.bf16.msra.mxu1 %v2745_v25  ;;  %v1493_v25 = vld [vmem:[#allocation6 + $0x70] sm:$0xff] }
 0x3e7   :  { %2336 = vmatprep.subr.bf16.mxu1 %v2754_v26  ;;  %v2739_v26 = vcombine.low %v1481_v18, %v1485_v19  ;;  %v2748_v27 = vcombine.high %v1489_v24, %v1493_v25  ;;  %v1597_v15 = vld [vmem:[#allocation6 + $0x3b0] sm:$0xff] }
 0x3e8   :  { %v1601_v18 = vld [vmem:[#allocation6 + $0x3d0] sm:$0xff] }
 0x3e9   :  { %v1605_v19 = vld [vmem:[#allocation6 + $0x3f0] sm:$0xff] }
 0x3ea   :  { %2337 = vmatpush1.bf16.msra.mxu1 %v2753_v29  ;;  %v1501_v29 = vld [vmem:[#allocation6 + $0xb0] sm:$0xff] }
 0x3eb   :  { %2338 = vmatprep.subr.bf16.mxu1 %v2762_v33  ;;  %v2747_v33 = vcombine.low %v1489_v24, %v1493_v25  ;;  %v2756_v34 = vcombine.high %v1497_v28, %v1501_v29  ;;  %v2859_v24 = vcombine.low %v1601_v18, %v1605_v19  ;;  %v1635_v25 = vsub.s32 6, %v3517_v58 }
 0x3ee   :  { %2339 = vmatpush1.bf16.msra.mxu1 %v2761_v36  ;;  %v1509_v36 = vld [vmem:[#allocation6 + $0xf0] sm:$0xff] }
 0x3ef   :  { %2340 = vmatprep.subr.bf16.mxu1 %v2770_v37  ;;  %v2755_v37 = vcombine.low %v1497_v28, %v1501_v29  ;;  %v2764_v38 = vcombine.high %v1505_v35, %v1509_v36 }
 0x3f2   :  { %2341 = vmatpush1.bf16.msra.mxu1 %v2769_v40  ;;  %v1517_v40 = vld [vmem:[#allocation6 + $0x130] sm:$0xff] }
 0x3f3   :  { %2342 = vmatprep.subr.bf16.mxu1 %v2778_v41  ;;  %v2763_v41 = vcombine.low %v1505_v35, %v1509_v36  ;;  %v2772_v42 = vcombine.high %v1513_v39, %v1517_v40 }
 0x3f6   :  { %2343 = vmatpush1.bf16.msra.mxu1 %v2777_v44  ;;  %v1525_v44 = vld [vmem:[#allocation6 + $0x170] sm:$0xff] }
 0x3f7   :  { %2344 = vmatprep.subr.bf16.mxu1 %v2786_v45  ;;  %v2771_v45 = vcombine.low %v1513_v39, %v1517_v40 }
 0x3fa   :  { %2345 = vmatpush1.bf16.msra.mxu1 %v2785_v48  ;;  %v2779_v48 = vcombine.low %v1521_v43, %v1525_v44 }
 0x3fb   :  { %2346 = vmatprep.subr.bf16.mxu1 %v2794_v49  ;;  %v2788_v49 = vcombine.high %v1529_v46, %v1533_v47 }
 0x3fe   :  { %2347 = vmatpush1.bf16.msra.mxu1 %v2793_v52  ;;  %v2787_v52 = vcombine.low %v1529_v46, %v1533_v47 }
 0x3ff   :  { %2348 = vmatprep.subr.bf16.mxu1 %v2802_v53  ;;  %v2796_v53 = vcombine.high %v1537_v50, %v1541_v51 }
 0x402   :  { %2349 = vmatpush1.bf16.msra.mxu1 %v2801_v56  ;;  %v2795_v56 = vcombine.low %v1537_v50, %v1541_v51 }
 0x403   :  { %2350 = vmatprep.subr.bf16.mxu1 %v2810_v57  ;;  %v2804_v57 = vcombine.high %v1545_v54, %v1549_v55 }
 0x406   :  { %2351 = vmatpush1.bf16.msra.mxu1 %v2809_v63  ;;  %v2803_v63 = vcombine.low %v1545_v54, %v1549_v55 }
 0x407   :  { %2352 = vmatprep.subr.bf16.mxu1 %v2818_v0  ;;  %v2812_v0 = vcombine.high %v1553_v60, %v1557_v62 }
 0x40a   :  { %2353 = vmatpush1.bf16.msra.mxu1 %v2817_v3  ;;  %v2811_v3 = vcombine.low %v1553_v60, %v1557_v62 }
 0x40b   :  { %2354 = vmatprep.subr.bf16.mxu1 %v2826_v4  ;;  %v2820_v4 = vcombine.high %v1561_v1, %v1565_v2 }
 0x40e   :  { %2355 = vmatpush1.bf16.msra.mxu1 %v2825_v7  ;;  %v2819_v7 = vcombine.low %v1561_v1, %v1565_v2 }
 0x40f   :  { %2356 = vmatprep.subr.bf16.mxu1 %v2834_v8  ;;  %v2828_v8 = vcombine.high %v1569_v5, %v1573_v6 }
 0x412   :  { %2357 = vmatpush1.bf16.msra.mxu1 %v2833_v11  ;;  %v2827_v11 = vcombine.low %v1569_v5, %v1573_v6 }
 0x413   :  { %2358 = vmatprep.subr.bf16.mxu1 %v2842_v30  ;;  %v2836_v30 = vcombine.high %v1577_v9, %v1581_v10 }
 0x416   :  { %2359 = vmatpush1.bf16.msra.mxu1 %v2841_v12  ;;  %v2835_v12 = vcombine.low %v1577_v9, %v1581_v10 }
 0x417   :  { %2360 = vmatprep.subr.bf16.mxu1 %v2850_v13  ;;  %v2844_v13 = vcombine.high %v1585_v31, %v1589_v32 }
 0x41a   :  { %2361 = vmatpush1.bf16.msra.mxu1 %v2849_v16  ;;  %v2843_v16 = vcombine.low %v1585_v31, %v1589_v32 }
 0x41b   :  { %2362 = vmatprep.subr.bf16.mxu1 %v2858_v17  ;;  %v2852_v17 = vcombine.high %v1593_v14, %v1597_v15 }
 0x41e   :  { %2363 = vmatpush1.bf16.msra.mxu1 %v2857_v22  ;;  %v2851_v22 = vcombine.low %v1593_v14, %v1597_v15  ;;  %v1619_v15 = vsub.s32 2, %v3517_v58 }
 0x41f   :  { %2375 = vmatprep.subr.bf16.mxu1 %v2740_v23  ;;  %v2860_v23 = vcombine.high %v1601_v18, %v1605_v19 }
 0x421   :  { %2365 = vmatmul.mubr.bf16.vlgmr.msra.gmra.mrb[12].mxu1 %v3569_v20 }
 0x422   :  { %2376 = vmatpush1.bf16.msra.mxu1 %v2739_v26  ;;  %2407 = vmatprep.mubr.bf16.mxu1 %v3571_v21  ;;  %v2780_v21 = vcombine.high %v1521_v43, %v1525_v44  ;;  %v3585_v26 = vld [vmem:[%s3659_s9] sm:$0xff] }
 0x423   :  { %2377 = vmatprep.subr.bf16.mxu1 %v2748_v27  ;;  %v1639_v27 = vsub.s32 7, %v3517_v58  ;;  %v1612_v28 = vrot.slane %v3585_v26, %v3520_v59  ;;  %v1636_v29 = vrot.slane %v3585_v26, %v1635_v25 }
 0x426   :  { %2378 = vmatpush1.bf16.msra.mxu1 %v2747_v33  ;;  %v1616_v33 = vrot.slane %v3585_v26, %v3526_v61 }
 0x427   :  { %2379 = vmatprep.subr.bf16.mxu1 %v2756_v34  ;;  %v1640_v34 = vrot.slane %v3585_v26, %v1639_v27 }
 0x42a   :  { %2380 = vmatpush1.bf16.msra.mxu1 %v2755_v37 }
 0x42b   :  { %2381 = vmatprep.subr.bf16.mxu1 %v2764_v38 }
 0x42e   :  { %2382 = vmatpush1.bf16.msra.mxu1 %v2763_v41 }
 0x42f   :  { %2383 = vmatprep.subr.bf16.mxu1 %v2772_v42 }
 0x432   :  { %2384 = vmatpush1.bf16.msra.mxu1 %v2771_v45 }
 0x433   :  { %2385 = vmatprep.subr.bf16.mxu1 %v2780_v21 }
 0x436   :  { %2386 = vmatpush1.bf16.msra.mxu1 %v2779_v48 }
 0x437   :  { %2387 = vmatprep.subr.bf16.mxu1 %v2788_v49 }
 0x43a   :  { %2388 = vmatpush1.bf16.msra.mxu1 %v2787_v52 }
 0x43b   :  { %2389 = vmatprep.subr.bf16.mxu1 %v2796_v53 }
 0x43e   :  { %2390 = vmatpush1.bf16.msra.mxu1 %v2795_v56 }
 0x43f   :  { %2391 = vmatprep.subr.bf16.mxu1 %v2804_v57 }
 0x442   :  { %2392 = vmatpush1.bf16.msra.mxu1 %v2803_v63 }
 0x443   :  { %2393 = vmatprep.subr.bf16.mxu1 %v2812_v0 }
 0x446   :  { %2394 = vmatpush1.bf16.msra.mxu1 %v2811_v3 }
 0x447   :  { %2395 = vmatprep.subr.bf16.mxu1 %v2820_v4 }
 0x44a   :  { %2396 = vmatpush1.bf16.msra.mxu1 %v2819_v7 }
 0x44b   :  { %2397 = vmatprep.subr.bf16.mxu1 %v2828_v8 }
 0x44e   :  { %2398 = vmatpush1.bf16.msra.mxu1 %v2827_v11 }
 0x44f   :  { %2399 = vmatprep.subr.bf16.mxu1 %v2836_v30 }
 0x452   :  { %2400 = vmatpush1.bf16.msra.mxu1 %v2835_v12 }
 0x453   :  { %2401 = vmatprep.subr.bf16.mxu1 %v2844_v13 }
 0x456   :  { %2402 = vmatpush1.bf16.msra.mxu1 %v2843_v16  ;;  %v1623_v16 = vsub.s32 3, %v3517_v58 }
 0x457   :  { %2403 = vmatprep.subr.bf16.mxu1 %v2852_v17  ;;  %v1620_v17 = vrot.slane %v3585_v26, %v1619_v15 }
 0x458   :  { %v1624_v18 = vrot.slane %v3585_v26, %v1623_v16 }
 0x45a   :  { %2404 = vmatpush1.bf16.msra.mxu1 %v2851_v22 }
 0x45b   :  { %2405 = vmatprep.subr.bf16.mxu1 %v2860_v23 }
 0x45e   :  { %2406 = vmatpush1.bf16.msra.mxu1 %v2859_v24 }
 0x461   :  { %2408 = vmatmul.mubr.bf16.vlgmr.msra.gmra.mrb[16].mxu1 %v3569_v20 }
 0x4b4   :  { %v2323_v20 = vpop.f32.mrb[8].mxu1  ;;  %v2452_v35 = vpop.f32.mrb[4].mxu0 }
 0x4b5   :  { %v2324_v36 = vadd.f32 %v2323_v20, %v1612_v28  ;;  %v2453_v37 = vadd.f32 %v2452_v35, %v1636_v29  ;;  %v2325_v38 = vpop.f32.mrb[9].mxu1  ;;  %v2454_v39 = vpop.f32.mrb[5].mxu0 }
 0x4b6   :  { %v2326_v40 = vadd.f32 %v2325_v38, %v1616_v33  ;;  %v2455_v41 = vadd.f32 %v2454_v39, %v1640_v34  ;;  %v2327_v42 = vpop.f32.mrb[10].mxu1  ;;  %v2456_v43 = vpop.f32.mrb[6].mxu0 }
 0x4b7   :  { %v2461_v44 = vmul.f32 0.5, %v2324_v36  ;;  %v2467_v45 = vmul.f32 0.5, %v2453_v37  ;;  %v2328_v59 = vadd.f32 %v2327_v42, %v1612_v28  ;;  %v2457_v21 = vadd.f32 %v2456_v43, %v1636_v29  ;;  %v2329_v46 = vpop.f32.mrb[11].mxu1  ;;  %v2458_v47 = vpop.f32.mrb[7].mxu0 }
 0x4b8   :  { %v2462_v48 = vmul.f32 0.5, %v2326_v40  ;;  %v2468_v61 = vmul.f32 0.5, %v2455_v41  ;;  %v2330_v49 = vadd.f32 %v2329_v46, %v1616_v33  ;;  %v2459_v50 = vadd.f32 %v2458_v47, %v1640_v34 }
 0x4b9   :  { %3155 = vtanh.f32 %v2461_v44  ;;  %v2469_v51 = vmul.f32 0.5, %v2328_v59  ;;  %v2475_v52 = vmul.f32 0.5, %v2457_v21  ;;  %v1627_v46 = vsub.s32 4, %v3517_v58 }
 0x4ba   :  { %3157 = vtanh.f32 %v2467_v45  ;;  %v2470_v53 = vmul.f32 0.5, %v2330_v49  ;;  %v2476_v54 = vmul.f32 0.5, %v2459_v50  ;;  %v1631_v47 = vsub.s32 5, %v3517_v58 }
 0x4bb   :  { %3159 = vtanh.f32 %v2462_v48  ;;  %v1628_v48 = vrot.slane %v3585_v26, %v1627_v46 }
 0x4bc   :  { %3161 = vtanh.f32 %v2468_v61  ;;  %v1632_v61 = vrot.slane %v3585_v26, %v1631_v47 }
 0x4bd   :  { %3163 = vtanh.f32 %v2469_v51 }
 0x4be   :  { %3165 = vtanh.f32 %v2475_v52 }
 0x4bf   :  { %3167 = vtanh.f32 %v2470_v53 }
 0x4c0   :  { %3169 = vtanh.f32 %v2476_v54 }
 0x4c3   :  { %v3156_v55 = vpop.eup %3155 }
 0x4c4   :  { %v3158_v56 = vpop.eup %3157  ;;  %v2493_v57 = vadd.f32 1.0, %v3156_v55 }
 0x4c5   :  { %v3160_v60 = vpop.eup %3159  ;;  %v2499_v62 = vadd.f32 1.0, %v3158_v56 }
 0x4c6   :  { %v3162_v63 = vpop.eup %3161  ;;  %v2509_v0 = vmul.f32 0.5, %v2493_v57  ;;  %v2494_v1 = vadd.f32 1.0, %v3160_v60 }
 0x4c7   :  { %v3164_v2 = vpop.eup %3163  ;;  %v2515_v3 = vmul.f32 0.5, %v2499_v62  ;;  %v2500_v4 = vadd.f32 1.0, %v3162_v63 }
 0x4c8   :  { %v3166_v5 = vpop.eup %3165  ;;  %2525 = vst [vmem:[%s3660_s10] sm:$0xff] %v2509_v0  ;;  %v2510_v6 = vmul.f32 0.5, %v2494_v1  ;;  %v2501_v7 = vadd.f32 1.0, %v3164_v2 }
 0x4c9   :  { %v3168_v8 = vpop.eup %3167  ;;  %2531 = vst [vmem:[%s3660_s10 + $0x30] sm:$0xff] %v2515_v3  ;;  %v2516_v9 = vmul.f32 0.5, %v2500_v4  ;;  %v2507_v10 = vadd.f32 1.0, %v3166_v5 }
 0x4ca   :  { %v3170_v11 = vpop.eup %3169  ;;  %2526 = vst [vmem:[%s3660_s10 + $0x8] sm:$0xff] %v2510_v6  ;;  %v2517_v30 = vmul.f32 0.5, %v2501_v7  ;;  %v2502_v31 = vadd.f32 1.0, %v3168_v8 }
 0x4cb   :  { %2532 = vst [vmem:[%s3660_s10 + $0x38] sm:$0xff] %v2516_v9  ;;  %v2523_v32 = vmul.f32 0.5, %v2507_v10  ;;  %v2508_v12 = vadd.f32 1.0, %v3170_v11 }
 0x4cc   :  { %2533 = vst [vmem:[%s3660_s10 + $0x40] sm:$0xff] %v2517_v30  ;;  %v2518_v13 = vmul.f32 0.5, %v2502_v31 }
 0x4cd   :  { %2539 = vst [vmem:[%s3660_s10 + $0x70] sm:$0xff] %v2523_v32  ;;  %v2524_v14 = vmul.f32 0.5, %v2508_v12 }
 0x4ce   :  { %2534 = vst [vmem:[%s3660_s10 + $0x48] sm:$0xff] %v2518_v13 }
 0x4cf   :  { %2540 = vst [vmem:[%s3660_s10 + $0x78] sm:$0xff] %v2524_v14 }
 0x4f4   :  { %v2366_v19 = vpop.f32.mrb[12].mxu1 }
 0x4f5   :  { %v2367_v22 = vadd.f32 %v2366_v19, %v1620_v17  ;;  %v2368_v23 = vpop.f32.mrb[13].mxu1 }
 0x4f6   :  { %v2369_v24 = vadd.f32 %v2368_v23, %v1624_v18  ;;  %v2370_v25 = vpop.f32.mrb[14].mxu1 }
 0x4f7   :  { %v2463_v27 = vmul.f32 0.5, %v2367_v22  ;;  %v2371_v28 = vadd.f32 %v2370_v25, %v1620_v17  ;;  %v2372_v29 = vpop.f32.mrb[15].mxu1 }
 0x4f8   :  { %v2464_v33 = vmul.f32 0.5, %v2369_v24  ;;  %v2373_v34 = vadd.f32 %v2372_v29, %v1624_v18 }
 0x4f9   :  { %3171 = vtanh.f32 %v2463_v27  ;;  %v2471_v20 = vmul.f32 0.5, %v2371_v28 }
 0x4fa   :  { %3173 = vtanh.f32 %v2464_v33  ;;  %v2472_v35 = vmul.f32 0.5, %v2373_v34 }
 0x4fb   :  { %3175 = vtanh.f32 %v2471_v20 }
 0x4fc   :  { %3177 = vtanh.f32 %v2472_v35 }
 0x503   :  { %v3172_v36 = vpop.eup %3171 }
 0x504   :  { %v3174_v37 = vpop.eup %3173  ;;  %v2495_v38 = vadd.f32 1.0, %v3172_v36 }
 0x505   :  { %v3176_v39 = vpop.eup %3175  ;;  %v2496_v40 = vadd.f32 1.0, %v3174_v37 }
 0x506   :  { %v3178_v41 = vpop.eup %3177  ;;  %v2511_v42 = vmul.f32 0.5, %v2495_v38  ;;  %v2503_v43 = vadd.f32 1.0, %v3176_v39 }
 0x507   :  { %v2512_v44 = vmul.f32 0.5, %v2496_v40  ;;  %v2504_v45 = vadd.f32 1.0, %v3178_v41 }
 0x508   :  { %2527 = vst [vmem:[%s3660_s10 + $0x10] sm:$0xff] %v2511_v42  ;;  %v2519_v59 = vmul.f32 0.5, %v2503_v43 }
 0x509   :  { %2528 = vst [vmem:[%s3660_s10 + $0x18] sm:$0xff] %v2512_v44  ;;  %v2520_v21 = vmul.f32 0.5, %v2504_v45 }
 0x50a   :  { %2535 = vst [vmem:[%s3660_s10 + $0x50] sm:$0xff] %v2519_v59 }
 0x50b   :  { %2536 = vst [vmem:[%s3660_s10 + $0x58] sm:$0xff] %v2520_v21 }
 0x534   :  { %v2409_v49 = vpop.f32.mrb[16].mxu1 }
 0x535   :  { %v2410_v50 = vadd.f32 %v2409_v49, %v1628_v48  ;;  %v2411_v51 = vpop.f32.mrb[17].mxu1 }
 0x536   :  { %v2412_v52 = vadd.f32 %v2411_v51, %v1632_v61  ;;  %v2413_v53 = vpop.f32.mrb[18].mxu1 }
 0x537   :  { %v2465_v54 = vmul.f32 0.5, %v2410_v50  ;;  %v2414_v55 = vadd.f32 %v2413_v53, %v1628_v48  ;;  %v2415_v56 = vpop.f32.mrb[19].mxu1 }
 0x538   :  { %v2466_v57 = vmul.f32 0.5, %v2412_v52  ;;  %v2416_v60 = vadd.f32 %v2415_v56, %v1632_v61 }
 0x539   :  { %3179 = vtanh.f32 %v2465_v54  ;;  %v2473_v62 = vmul.f32 0.5, %v2414_v55 }
 0x53a   :  { %3181 = vtanh.f32 %v2466_v57  ;;  %v2474_v63 = vmul.f32 0.5, %v2416_v60 }
 0x53b   :  { %3183 = vtanh.f32 %v2473_v62 }
 0x53c   :  { %3185 = vtanh.f32 %v2474_v63 }
 0x543   :  { %v3180_v58 = vpop.eup %3179 }
 0x544   :  { %v3182_v0 = vpop.eup %3181  ;;  %v2497_v1 = vadd.f32 1.0, %v3180_v58 }
 0x545   :  { %v3184_v26 = vpop.eup %3183  ;;  %v2498_v2 = vadd.f32 1.0, %v3182_v0 }
 0x546   :  { %v3186_v3 = vpop.eup %3185  ;;  %v2513_v4 = vmul.f32 0.5, %v2497_v1  ;;  %v2505_v5 = vadd.f32 1.0, %v3184_v26 }
 0x547   :  { %v2514_v6 = vmul.f32 0.5, %v2498_v2  ;;  %v2506_v7 = vadd.f32 1.0, %v3186_v3 }
 0x548   :  { %2529 = vst [vmem:[%s3660_s10 + $0x20] sm:$0xff] %v2513_v4  ;;  %v2521_v8 = vmul.f32 0.5, %v2505_v5 }
 0x549   :  { %2530 = vst [vmem:[%s3660_s10 + $0x28] sm:$0xff] %v2514_v6  ;;  %v2522_v9 = vmul.f32 0.5, %v2506_v7 }
 0x54a   :  { %2537 = vst [vmem:[%s3660_s10 + $0x60] sm:$0xff] %v2521_v8 }
 0x54b   :  { %2538 = vst [vmem:[%s3660_s10 + $0x68] sm:$0xff] %v2522_v9 }
 0x54c   :  { %2557 = vsyncpa [#allocation3], 1 }
 0x54d   :  { %2558 = vsyncpa [#allocation5], 1 }

</bundles_post_ra>
